<compile_context>
chip_gen: v7x
topology: tpu7x:2x2x1
jax: 0.10.0
libtpu: 0.0.40
codegen_flags: <defaults>
</compile_context>

<pallas_src>
import functools

import jax
import jax.numpy as jnp
from jax.experimental import pallas as pl
from jax.experimental.pallas import tpu as pltpu

CFG = dict(
    vocab_size=128,
    context_length=16,
    emb_dim=32,
    n_heads=4,
    n_layers=2,
    drop_rate=0.0,
    qkv_bias=False,
)


# ----------------------------- in-kernel helpers -----------------------------

def _layernorm(x, scale, shift, eps=1e-5):
    # PyTorch LayerNorm semantics (unbiased=False variance over last dim), f32.
    mean = jnp.mean(x, axis=-1, keepdims=True)
    var = jnp.mean((x - mean) ** 2, axis=-1, keepdims=True)
    return (x - mean) * jax.lax.rsqrt(var + eps) * scale + shift


def _gelu(x):
    # tanh-approximation GELU (as in the reference GELU module), f32.
    return 0.5 * x * (1.0 + jnp.tanh(
        jnp.sqrt(2.0 / jnp.pi) * (x + 0.044715 * x ** 3)))


# ------------------------- per-(sequence, layer) kernel ------------------------

def gpt_layer_kernel(x_ref,                       # (S, E) f32, one sequence
                     ln1s_ref, ln1b_ref,          # (1, E) f32
                     wq_ref, wk_ref, wv_ref,      # (H, E, Dh) bf16 (scale folded in wq)
                     wo_ref, bo_ref,              # (E, E) bf16, (1, E) f32
                     ln2s_ref, ln2b_ref,          # (1, E) f32
                     w1_ref, b1_ref,              # (E, 4E) bf16, (1, 4E) f32
                     w2_ref, b2_ref,              # (4E, E) bf16, (1, E) f32
                     fns_ref, fnb_ref,            # (1, E) f32, final LayerNorm
                     wout_ref,                    # (E, V) bf16
                     o_ref,                       # (S, V) f32
                     x_scr,                       # (S, E) f32 VMEM carry
                     *, n_heads):
    l = pl.program_id(1)
    bf16 = jnp.bfloat16

    @pl.when(l == 0)
    def _():
        x_scr[...] = x_ref[...]                   # load activations once per sequence

    x = x_scr[...]                                # (S, E) f32, carried across layers
    S, E = x.shape
    Dh = E // n_heads

    # Additive causal mask bias (0 on/below diagonal, -1e30 above). Each row
    # tile is exactly one sequence, so a plain causal mask is correct.
    row = jax.lax.broadcasted_iota(jnp.int32, (S, S), 0)
    col = jax.lax.broadcasted_iota(jnp.int32, (S, S), 1)
    mask_bias = jnp.where(col <= row, 0.0, -1e30).astype(jnp.float32)

    # ---- attention sub-block: x + Wo(concat_h softmax(q_h k_h^T) v_h) + bo ----
    shortcut = x
    xn = _layernorm(x, ln1s_ref[...], ln1b_ref[...])
    xn_b = xn.astype(bf16)

    ctx_heads = []
    for h in range(n_heads):                      # static per-head loop
        qh = jnp.dot(xn_b, wq_ref[h], preferred_element_type=jnp.float32)  # (S, Dh)
        kh = jnp.dot(xn_b, wk_ref[h], preferred_element_type=jnp.float32)
        vh = jnp.dot(xn_b, wv_ref[h], preferred_element_type=jnp.float32)
        s = jax.lax.dot_general(qh.astype(bf16), kh.astype(bf16),
                                (((1,), (1,)), ((), ())),
                                preferred_element_type=jnp.float32)         # (S, S)
        s = s + mask_bias
        s = s - jnp.max(s, axis=-1, keepdims=True)
        p = jnp.exp(s)
        a = p * pl.reciprocal(jnp.sum(p, axis=-1, keepdims=True), approx=True)
        ctx_heads.append(jnp.dot(a.astype(bf16), vh.astype(bf16),
                                 preferred_element_type=jnp.float32))       # (S, Dh)

    ctx = jnp.concatenate(ctx_heads, axis=-1)     # (S, E): single K=E out-proj
    attn = jnp.dot(ctx.astype(bf16), wo_ref[...],
                   preferred_element_type=jnp.float32) + bo_ref[...]
    x = shortcut + attn

    # ---- feed-forward sub-block: x + W2(GELU(W1 LN(x) + b1)) + b2 ----
    shortcut = x
    xn = _layernorm(x, ln2s_ref[...], ln2b_ref[...])
    h1 = _gelu(jnp.dot(xn.astype(bf16), w1_ref[...],
                       preferred_element_type=jnp.float32) + b1_ref[...])
    x = shortcut + jnp.dot(h1.astype(bf16), w2_ref[...],
                           preferred_element_type=jnp.float32) + b2_ref[...]

    x_scr[...] = x                                # carry to next layer step

    # ---- final LayerNorm + vocab head on the last layer step only ----
    @pl.when(l == pl.num_programs(1) - 1)
    def _():
        xn_f = _layernorm(x, fns_ref[...], fnb_ref[...])
        o_ref[...] = jnp.dot(xn_f.astype(bf16), wout_ref[...],
                             preferred_element_type=jnp.float32)


# --------------------------------- parameters ---------------------------------

def init_params(key, cfg):
    E = cfg['emb_dim']
    V = cfg['vocab_size']
    C = cfg['context_length']
    L = cfg['n_layers']
    H = cfg['n_heads']
    Dh = E // H
    H4 = 4 * E
    bf16 = jnp.bfloat16
    keys = jax.random.split(key, 3 + L)

    def normal(k, shape):
        return 0.02 * jax.random.normal(k, shape, jnp.float32)

    def per_head(w):
        # (E_in, E_out) with head-h output columns [h*Dh:(h+1)*Dh] -> (H, E, Dh)
        return jnp.transpose(w.reshape(E, H, Dh), (1, 0, 2))

    ln1_s, ln1_b, ln2_s, ln2_b = [], [], [], []
    wq, wk, wv, wo, bo = [], [], [], [], []
    w1, b1, w2, b2 = [], [], [], []
    for layer in range(L):
        ks = jax.random.split(keys[3 + layer], 6)
        ln1_s.append(jnp.ones((1, E), jnp.float32))
        ln1_b.append(jnp.zeros((1, E), jnp.float32))
        # 1/sqrt(Dh) folded into the query weights at init (no per-step scale).
        wq.append(per_head(normal(ks[0], (E, E)) * (float(Dh) ** -0.5)))
        wk.append(per_head(normal(ks[1], (E, E))))
        wv.append(per_head(normal(ks[2], (E, E))))      # qkv_bias=False
        wo.append(normal(ks[3], (E, E)))                # attention out-proj
        bo.append(jnp.zeros((1, E), jnp.float32))
        ln2_s.append(jnp.ones((1, E), jnp.float32))
        ln2_b.append(jnp.zeros((1, E), jnp.float32))
        w1.append(normal(ks[4], (E, H4)))               # FF expand
        b1.append(jnp.zeros((1, H4), jnp.float32))
        w2.append(normal(ks[5], (H4, E)))               # FF contract
        b2.append(jnp.zeros((1, E), jnp.float32))

    return {
        'tok_emb': normal(keys[0], (V, E)),
        'pos_emb': normal(keys[1], (C, E)),
        'ln1_s': jnp.stack(ln1_s), 'ln1_b': jnp.stack(ln1_b),
        'wq': jnp.stack(wq).astype(bf16),               # (L, H, E, Dh)
        'wk': jnp.stack(wk).astype(bf16),
        'wv': jnp.stack(wv).astype(bf16),
        'wo': jnp.stack(wo).astype(bf16), 'bo': jnp.stack(bo),
        'ln2_s': jnp.stack(ln2_s), 'ln2_b': jnp.stack(ln2_b),
        'w1': jnp.stack(w1).astype(bf16), 'b1': jnp.stack(b1),
        'w2': jnp.stack(w2).astype(bf16), 'b2': jnp.stack(b2),
        'final_norm_scale': jnp.ones((1, E), jnp.float32),
        'final_norm_shift': jnp.zeros((1, E), jnp.float32),
        'wout': normal(keys[2], (E, V)).astype(bf16),   # Linear(E, V, bias=False)
    }


# --------------------------------- full model ---------------------------------

def gpt_forward(in_idx, params, cfg):
    B, S = in_idx.shape
    E = cfg['emb_dim']
    V = cfg['vocab_size']
    H = cfg['n_heads']
    L = cfg['n_layers']
    Dh = E // H
    H4 = 4 * E
    assert S <= cfg['context_length']
    assert S % 8 == 0, "sequence length must be a sublane multiple for (S,E) tiles"

    # Embedding lookup + positional add stay in plain JAX (data-dependent
    # gather); dropout on the embeddings is identity with drop_rate=0.
    # TODO(synk): move the gather in-kernel (PrefetchScalarGridSpec +
    # pl.Element row gather) only if it becomes measurable at larger S.
    x = params['tok_emb'][in_idx] + params['pos_emb'][:S][None, :, :]
    x = x.reshape(B * S, E)                       # batch-major rows, one seq per tile

    def layer_spec(*tail):                        # leading L dim streamed & squeezed
        n = len(tail)
        return pl.BlockSpec((None,) + tail, lambda b, l, _n=n: (l,) + (0,) * _n)

    def shared_spec(*dims):                       # layer-invariant params
        n = len(dims)
        return pl.BlockSpec(dims, lambda b, l, _n=n: (0,) * _n)

    in_specs = [
        pl.BlockSpec((S, E), lambda b, l: (b, 0)),                       # x
        layer_spec(1, E), layer_spec(1, E),                              # ln1 s/b
        layer_spec(H, E, Dh), layer_spec(H, E, Dh), layer_spec(H, E, Dh),  # wq wk wv
        layer_spec(E, E), layer_spec(1, E),                              # wo, bo
        layer_spec(1, E), layer_spec(1, E),                              # ln2 s/b
        layer_spec(E, H4), layer_spec(1, H4),                            # w1, b1
        layer_spec(H4, E), layer_spec(1, E),                             # w2, b2
        shared_spec(1, E), shared_spec(1, E),                            # final norm
        shared_spec(E, V),                                               # vocab head
    ]

    kernel = functools.partial(gpt_layer_kernel, n_heads=H)
    inputs = (x,
              params['ln1_s'], params['ln1_b'],
              params['wq'], params['wk'], params['wv'],
              params['wo'], params['bo'],
              params['ln2_s'], params['ln2_b'],
              params['w1'], params['b1'],
              params['w2'], params['b2'],
              params['final_norm_scale'], params['final_norm_shift'],
              params['wout'])

    logits = pl.pallas_call(
        kernel,
        out_shape=jax.ShapeDtypeStruct((B * S, V), jnp.float32),
        grid_spec=pltpu.PrefetchScalarGridSpec(
            num_scalar_prefetch=0,
            grid=(B, L),                               # sequences x layers
            in_specs=in_specs,
            out_specs=pl.BlockSpec((S, V), lambda b, l: (b, 0)),
            scratch_shapes=[pltpu.VMEM((S, E), jnp.float32)]),
        compiler_params=pltpu.CompilerParams(
            dimension_semantics=("parallel", "arbitrary")),
    )(*inputs)
    return logits.reshape(B, S, V)


if __name__ == "__main__":
    key = jax.random.PRNGKey(0)
    k_params, k_idx = jax.random.split(key)

    params = init_params(k_params, CFG)

    B, S = 2, 8
    in_idx = jax.random.randint(k_idx, (B, S), 0, CFG['vocab_size'],
                                dtype=jnp.int32)

    logits = gpt_forward(in_idx, params, CFG)
    logits = jax.block_until_ready(logits)

    assert logits.shape == (B, S, CFG['vocab_size']), logits.shape
    assert logits.dtype == jnp.float32
    assert bool(jnp.all(jnp.isfinite(logits)))
    print("KERNEL_OK")
</pallas_src>

<mosaic_0001>
module attributes {stable_mosaic.version = 11 : i64} {
  func.func @gpt_layer_kernel(%arg0: i32, %arg1: i32, %arg2: memref<8x32xf32, #tpu.memory_space<vmem>>, %arg3: memref<1x1x32xf32, #tpu.memory_space<vmem>>, %arg4: memref<1x1x32xf32, #tpu.memory_space<vmem>>, %arg5: memref<1x4x32x8xbf16, #tpu.memory_space<vmem>>, %arg6: memref<1x4x32x8xbf16, #tpu.memory_space<vmem>>, %arg7: memref<1x4x32x8xbf16, #tpu.memory_space<vmem>>, %arg8: memref<1x32x32xbf16, #tpu.memory_space<vmem>>, %arg9: memref<1x1x32xf32, #tpu.memory_space<vmem>>, %arg10: memref<1x1x32xf32, #tpu.memory_space<vmem>>, %arg11: memref<1x1x32xf32, #tpu.memory_space<vmem>>, %arg12: memref<1x32x128xbf16, #tpu.memory_space<vmem>>, %arg13: memref<1x1x128xf32, #tpu.memory_space<vmem>>, %arg14: memref<1x128x32xbf16, #tpu.memory_space<vmem>>, %arg15: memref<1x1x32xf32, #tpu.memory_space<vmem>>, %arg16: memref<1x32xf32, #tpu.memory_space<vmem>>, %arg17: memref<1x32xf32, #tpu.memory_space<vmem>>, %arg18: memref<32x128xbf16, #tpu.memory_space<vmem>>, %arg19: memref<8x128xf32, #tpu.memory_space<vmem>>, %arg20: memref<8x32xf32, #tpu.memory_space<vmem>>) attributes {dimension_semantics = [#tpu.dimension_semantics<parallel>, #tpu.dimension_semantics<arbitrary>], iteration_bounds = array<i64: 2, 2>, scalar_prefetch = 0 : i64, scratch_operands = 1 : i64, tpu.core_type = #tpu.core_type<tc>, window_params = [{transform_indices = @transform_0, window_bounds = array<i64: 8, 32>}, {transform_indices = @transform_1, window_bounds = array<i64: 1, 1, 32>}, {transform_indices = @transform_2, window_bounds = array<i64: 1, 1, 32>}, {transform_indices = @transform_3, window_bounds = array<i64: 1, 4, 32, 8>}, {transform_indices = @transform_4, window_bounds = array<i64: 1, 4, 32, 8>}, {transform_indices = @transform_5, window_bounds = array<i64: 1, 4, 32, 8>}, {transform_indices = @transform_6, window_bounds = array<i64: 1, 32, 32>}, {transform_indices = @transform_7, window_bounds = array<i64: 1, 1, 32>}, {transform_indices = @transform_8, window_bounds = array<i64: 1, 1, 32>}, {transform_indices = @transform_9, window_bounds = array<i64: 1, 1, 32>}, {transform_indices = @transform_10, window_bounds = array<i64: 1, 32, 128>}, {transform_indices = @transform_11, window_bounds = array<i64: 1, 1, 128>}, {transform_indices = @transform_12, window_bounds = array<i64: 1, 128, 32>}, {transform_indices = @transform_13, window_bounds = array<i64: 1, 1, 32>}, {pipeline_mode = #tpu.pipeline_mode<synchronous>, transform_indices = @transform_14, window_bounds = array<i64: 1, 32>}, {pipeline_mode = #tpu.pipeline_mode<synchronous>, transform_indices = @transform_15, window_bounds = array<i64: 1, 32>}, {pipeline_mode = #tpu.pipeline_mode<synchronous>, transform_indices = @transform_16, window_bounds = array<i64: 32, 128>}, {transform_indices = @transform_17, window_bounds = array<i64: 8, 128>}]} {
    %c0_i32 = arith.constant 0 : i32
    %0 = arith.cmpi eq, %arg1, %c0_i32 : i32
    %1 = arith.extui %0 : i1 to i32
    %c0_i32_0 = arith.constant 0 : i32
    %2 = arith.cmpi ne, %1, %c0_i32_0 : i32
    scf.if %2 {
      %c0_126 = arith.constant 0 : index
      %c0_127 = arith.constant 0 : index
      %212 = vector.load %arg2[%c0_126, %c0_127] : memref<8x32xf32, #tpu.memory_space<vmem>>, vector<8x32xf32>
      %c0_128 = arith.constant 0 : index
      %c0_129 = arith.constant 0 : index
      %213 = vector.load %arg20[%c0_128, %c0_129] : memref<8x32xf32, #tpu.memory_space<vmem>>, vector<8x32xf32>
      tpu.vector_store %arg20[%c0_128, %c0_129], %212 {strides = array<i32>} : memref<8x32xf32, #tpu.memory_space<vmem>>, vector<8x32xf32>,
    } else {
    }
    %c0 = arith.constant 0 : index
    %c0_1 = arith.constant 0 : index
    %3 = vector.load %arg20[%c0, %c0_1] : memref<8x32xf32, #tpu.memory_space<vmem>>, vector<8x32xf32>
    %4 = tpu.iota {dimensions = array<i32: 0>} : vector<8x8xi32>
    %5 = tpu.iota {dimensions = array<i32: 1>} : vector<8x8xi32>
    %6 = arith.cmpi sle, %5, %4 : vector<8x8xi32>
    %cst = arith.constant 0.000000e+00 : f32
    %cst_2 = arith.constant -1.000000e+30 : f32
    %7 = vector.broadcast %cst : f32 to vector<8x8xf32>
    %8 = vector.broadcast %cst_2 : f32 to vector<8x8xf32>
    %9 = arith.select %6, %7, %8 : vector<8x8xi1>, vector<8x8xf32>
    %c0_3 = arith.constant 0 : index
    %c0_4 = arith.constant 0 : index
    %c0_5 = arith.constant 0 : index
    %10 = vector.load %arg3[%c0_3, %c0_4, %c0_5] : memref<1x1x32xf32, #tpu.memory_space<vmem>>, vector<1x1x32xf32>
    %11 = vector.shape_cast %10 : vector<1x1x32xf32> to vector<1x32xf32>
    %c0_6 = arith.constant 0 : index
    %c0_7 = arith.constant 0 : index
    %c0_8 = arith.constant 0 : index
    %12 = vector.load %arg4[%c0_6, %c0_7, %c0_8] : memref<1x1x32xf32, #tpu.memory_space<vmem>>, vector<1x1x32xf32>
    %13 = vector.shape_cast %12 : vector<1x1x32xf32> to vector<1x32xf32>
    %cst_9 = arith.constant dense<0.000000e+00> : vector<8xf32>
    %14 = vector.multi_reduction <add>, %3, %cst_9 [1] : vector<8x32xf32> to vector<8xf32>
    %15 = vector.shape_cast %14 : vector<8xf32> to vector<8x1xf32>
    %cst_10 = arith.constant 3.200000e+01 : f32
    %16 = vector.broadcast %cst_10 : f32 to vector<8x1xf32>
    %17 = arith.divf %15, %16 : vector<8x1xf32>
    %18 = vector.broadcast %17 : vector<8x1xf32> to vector<8x32xf32>
    %19 = arith.subf %3, %18 : vector<8x32xf32>
    %20 = arith.mulf %19, %19 : vector<8x32xf32>
    %cst_11 = arith.constant dense<0.000000e+00> : vector<8xf32>
    %21 = vector.multi_reduction <add>, %20, %cst_11 [1] : vector<8x32xf32> to vector<8xf32>
    %22 = vector.shape_cast %21 : vector<8xf32> to vector<8x1xf32>
    %cst_12 = arith.constant 3.200000e+01 : f32
    %23 = vector.broadcast %cst_12 : f32 to vector<8x1xf32>
    %24 = arith.divf %22, %23 : vector<8x1xf32>
    %25 = vector.broadcast %17 : vector<8x1xf32> to vector<8x32xf32>
    %26 = arith.subf %3, %25 : vector<8x32xf32>
    %cst_13 = arith.constant 9.99999974E-6 : f32
    %27 = vector.broadcast %cst_13 : f32 to vector<8x1xf32>
    %28 = arith.addf %24, %27 : vector<8x1xf32>
    %29 = math.rsqrt %28 : vector<8x1xf32>
    %30 = vector.broadcast %29 : vector<8x1xf32> to vector<8x32xf32>
    %31 = arith.mulf %26, %30 : vector<8x32xf32>
    %32 = vector.broadcast %11 : vector<1x32xf32> to vector<8x32xf32>
    %33 = arith.mulf %31, %32 : vector<8x32xf32>
    %34 = vector.broadcast %13 : vector<1x32xf32> to vector<8x32xf32>
    %35 = arith.addf %33, %34 : vector<8x32xf32>
    %36 = arith.truncf %35 : vector<8x32xf32> to vector<8x32xbf16>
    %c0_14 = arith.constant 0 : index
    %c0_15 = arith.constant 0 : index
    %c0_16 = arith.constant 0 : index
    %c0_17 = arith.constant 0 : index
    %37 = vector.load %arg5[%c0_14, %c0_15, %c0_16, %c0_17] : memref<1x4x32x8xbf16, #tpu.memory_space<vmem>>, vector<1x1x32x8xbf16>
    %38 = vector.shape_cast %37 : vector<1x1x32x8xbf16> to vector<32x8xbf16>
    %cst_18 = arith.constant dense<0.000000e+00> : vector<8x8xf32>
    %39 = tpu.matmul %36, %38, %cst_18 {dimension_numbers = #tpu.dot_dimension_numbers<[1], [0], [0], [1], [0, 0, 1, 1], [], []>} : vector<8x32xbf16>, vector<32x8xbf16>, vector<8x8xf32> -> vector<8x8xf32>
    %c0_19 = arith.constant 0 : index
    %c0_20 = arith.constant 0 : index
    %c0_21 = arith.constant 0 : index
    %c0_22 = arith.constant 0 : index
    %40 = vector.load %arg6[%c0_19, %c0_20, %c0_21, %c0_22] : memref<1x4x32x8xbf16, #tpu.memory_space<vmem>>, vector<1x1x32x8xbf16>
    %41 = vector.shape_cast %40 : vector<1x1x32x8xbf16> to vector<32x8xbf16>
    %cst_23 = arith.constant dense<0.000000e+00> : vector<8x8xf32>
    %42 = tpu.matmul %36, %41, %cst_23 {dimension_numbers = #tpu.dot_dimension_numbers<[1], [0], [0], [1], [0, 0, 1, 1], [], []>} : vector<8x32xbf16>, vector<32x8xbf16>, vector<8x8xf32> -> vector<8x8xf32>
    %c0_24 = arith.constant 0 : index
    %c0_25 = arith.constant 0 : index
    %c0_26 = arith.constant 0 : index
    %c0_27 = arith.constant 0 : index
    %43 = vector.load %arg7[%c0_24, %c0_25, %c0_26, %c0_27] : memref<1x4x32x8xbf16, #tpu.memory_space<vmem>>, vector<1x1x32x8xbf16>
    %44 = vector.shape_cast %43 : vector<1x1x32x8xbf16> to vector<32x8xbf16>
    %cst_28 = arith.constant dense<0.000000e+00> : vector<8x8xf32>
    %45 = tpu.matmul %36, %44, %cst_28 {dimension_numbers = #tpu.dot_dimension_numbers<[1], [0], [0], [1], [0, 0, 1, 1], [], []>} : vector<8x32xbf16>, vector<32x8xbf16>, vector<8x8xf32> -> vector<8x8xf32>
    %46 = arith.truncf %39 : vector<8x8xf32> to vector<8x8xbf16>
    %47 = arith.truncf %42 : vector<8x8xf32> to vector<8x8xbf16>
    %cst_29 = arith.constant dense<0.000000e+00> : vector<8x8xf32>
    %48 = tpu.matmul %46, %47, %cst_29 {dimension_numbers = #tpu.dot_dimension_numbers<[1], [1], [0], [0], [0, 0, 1, 0], [], []>} : vector<8x8xbf16>, vector<8x8xbf16>, vector<8x8xf32> -> vector<8x8xf32>
    %49 = arith.addf %48, %9 : vector<8x8xf32>
    %cst_30 = arith.constant dense<0xFF800000> : vector<8xf32>
    %50 = vector.multi_reduction <maximumf>, %49, %cst_30 [1] : vector<8x8xf32> to vector<8xf32>
    %51 = vector.shape_cast %50 : vector<8xf32> to vector<8x1xf32>
    %52 = vector.broadcast %51 : vector<8x1xf32> to vector<8x8xf32>
    %53 = arith.subf %49, %52 : vector<8x8xf32>
    %54 = math.exp %53 : vector<8x8xf32>
    %cst_31 = arith.constant dense<0.000000e+00> : vector<8xf32>
    %55 = vector.multi_reduction <add>, %54, %cst_31 [1] : vector<8x8xf32> to vector<8xf32>
    %56 = vector.shape_cast %55 : vector<8xf32> to vector<8x1xf32>
    %57 = tpu.reciprocal %56 {approx = true} : vector<8x1xf32> -> vector<8x1xf32>
    %58 = vector.broadcast %57 : vector<8x1xf32> to vector<8x8xf32>
    %59 = arith.mulf %54, %58 : vector<8x8xf32>
    %60 = arith.truncf %59 : vector<8x8xf32> to vector<8x8xbf16>
    %61 = arith.truncf %45 : vector<8x8xf32> to vector<8x8xbf16>
    %cst_32 = arith.constant dense<0.000000e+00> : vector<8x8xf32>
    %62 = tpu.matmul %60, %61, %cst_32 {dimension_numbers = #tpu.dot_dimension_numbers<[1], [0], [0], [1], [0, 0, 1, 1], [], []>} : vector<8x8xbf16>, vector<8x8xbf16>, vector<8x8xf32> -> vector<8x8xf32>
    %c0_33 = arith.constant 0 : index
    %c1 = arith.constant 1 : index
    %c0_34 = arith.constant 0 : index
    %c0_35 = arith.constant 0 : index
    %63 = vector.load %arg5[%c0_33, %c1, %c0_34, %c0_35] : memref<1x4x32x8xbf16, #tpu.memory_space<vmem>>, vector<1x1x32x8xbf16>
    %64 = vector.shape_cast %63 : vector<1x1x32x8xbf16> to vector<32x8xbf16>
    %cst_36 = arith.constant dense<0.000000e+00> : vector<8x8xf32>
    %65 = tpu.matmul %36, %64, %cst_36 {dimension_numbers = #tpu.dot_dimension_numbers<[1], [0], [0], [1], [0, 0, 1, 1], [], []>} : vector<8x32xbf16>, vector<32x8xbf16>, vector<8x8xf32> -> vector<8x8xf32>
    %c0_37 = arith.constant 0 : index
    %c1_38 = arith.constant 1 : index
    %c0_39 = arith.constant 0 : index
    %c0_40 = arith.constant 0 : index
    %66 = vector.load %arg6[%c0_37, %c1_38, %c0_39, %c0_40] : memref<1x4x32x8xbf16, #tpu.memory_space<vmem>>, vector<1x1x32x8xbf16>
    %67 = vector.shape_cast %66 : vector<1x1x32x8xbf16> to vector<32x8xbf16>
    %cst_41 = arith.constant dense<0.000000e+00> : vector<8x8xf32>
    %68 = tpu.matmul %36, %67, %cst_41 {dimension_numbers = #tpu.dot_dimension_numbers<[1], [0], [0], [1], [0, 0, 1, 1], [], []>} : vector<8x32xbf16>, vector<32x8xbf16>, vector<8x8xf32> -> vector<8x8xf32>
    %c0_42 = arith.constant 0 : index
    %c1_43 = arith.constant 1 : index
    %c0_44 = arith.constant 0 : index
    %c0_45 = arith.constant 0 : index
    %69 = vector.load %arg7[%c0_42, %c1_43, %c0_44, %c0_45] : memref<1x4x32x8xbf16, #tpu.memory_space<vmem>>, vector<1x1x32x8xbf16>
    %70 = vector.shape_cast %69 : vector<1x1x32x8xbf16> to vector<32x8xbf16>
    %cst_46 = arith.constant dense<0.000000e+00> : vector<8x8xf32>
    %71 = tpu.matmul %36, %70, %cst_46 {dimension_numbers = #tpu.dot_dimension_numbers<[1], [0], [0], [1], [0, 0, 1, 1], [], []>} : vector<8x32xbf16>, vector<32x8xbf16>, vector<8x8xf32> -> vector<8x8xf32>
    %72 = arith.truncf %65 : vector<8x8xf32> to vector<8x8xbf16>
    %73 = arith.truncf %68 : vector<8x8xf32> to vector<8x8xbf16>
    %cst_47 = arith.constant dense<0.000000e+00> : vector<8x8xf32>
    %74 = tpu.matmul %72, %73, %cst_47 {dimension_numbers = #tpu.dot_dimension_numbers<[1], [1], [0], [0], [0, 0, 1, 0], [], []>} : vector<8x8xbf16>, vector<8x8xbf16>, vector<8x8xf32> -> vector<8x8xf32>
    %75 = arith.addf %74, %9 : vector<8x8xf32>
    %cst_48 = arith.constant dense<0xFF800000> : vector<8xf32>
    %76 = vector.multi_reduction <maximumf>, %75, %cst_48 [1] : vector<8x8xf32> to vector<8xf32>
    %77 = vector.shape_cast %76 : vector<8xf32> to vector<8x1xf32>
    %78 = vector.broadcast %77 : vector<8x1xf32> to vector<8x8xf32>
    %79 = arith.subf %75, %78 : vector<8x8xf32>
    %80 = math.exp %79 : vector<8x8xf32>
    %cst_49 = arith.constant dense<0.000000e+00> : vector<8xf32>
    %81 = vector.multi_reduction <add>, %80, %cst_49 [1] : vector<8x8xf32> to vector<8xf32>
    %82 = vector.shape_cast %81 : vector<8xf32> to vector<8x1xf32>
    %83 = tpu.reciprocal %82 {approx = true} : vector<8x1xf32> -> vector<8x1xf32>
    %84 = vector.broadcast %83 : vector<8x1xf32> to vector<8x8xf32>
    %85 = arith.mulf %80, %84 : vector<8x8xf32>
    %86 = arith.truncf %85 : vector<8x8xf32> to vector<8x8xbf16>
    %87 = arith.truncf %71 : vector<8x8xf32> to vector<8x8xbf16>
    %cst_50 = arith.constant dense<0.000000e+00> : vector<8x8xf32>
    %88 = tpu.matmul %86, %87, %cst_50 {dimension_numbers = #tpu.dot_dimension_numbers<[1], [0], [0], [1], [0, 0, 1, 1], [], []>} : vector<8x8xbf16>, vector<8x8xbf16>, vector<8x8xf32> -> vector<8x8xf32>
    %c0_51 = arith.constant 0 : index
    %c2 = arith.constant 2 : index
    %c0_52 = arith.constant 0 : index
    %c0_53 = arith.constant 0 : index
    %89 = vector.load %arg5[%c0_51, %c2, %c0_52, %c0_53] : memref<1x4x32x8xbf16, #tpu.memory_space<vmem>>, vector<1x1x32x8xbf16>
    %90 = vector.shape_cast %89 : vector<1x1x32x8xbf16> to vector<32x8xbf16>
    %cst_54 = arith.constant dense<0.000000e+00> : vector<8x8xf32>
    %91 = tpu.matmul %36, %90, %cst_54 {dimension_numbers = #tpu.dot_dimension_numbers<[1], [0], [0], [1], [0, 0, 1, 1], [], []>} : vector<8x32xbf16>, vector<32x8xbf16>, vector<8x8xf32> -> vector<8x8xf32>
    %c0_55 = arith.constant 0 : index
    %c2_56 = arith.constant 2 : index
    %c0_57 = arith.constant 0 : index
    %c0_58 = arith.constant 0 : index
    %92 = vector.load %arg6[%c0_55, %c2_56, %c0_57, %c0_58] : memref<1x4x32x8xbf16, #tpu.memory_space<vmem>>, vector<1x1x32x8xbf16>
    %93 = vector.shape_cast %92 : vector<1x1x32x8xbf16> to vector<32x8xbf16>
    %cst_59 = arith.constant dense<0.000000e+00> : vector<8x8xf32>
    %94 = tpu.matmul %36, %93, %cst_59 {dimension_numbers = #tpu.dot_dimension_numbers<[1], [0], [0], [1], [0, 0, 1, 1], [], []>} : vector<8x32xbf16>, vector<32x8xbf16>, vector<8x8xf32> -> vector<8x8xf32>
    %c0_60 = arith.constant 0 : index
    %c2_61 = arith.constant 2 : index
    %c0_62 = arith.constant 0 : index
    %c0_63 = arith.constant 0 : index
    %95 = vector.load %arg7[%c0_60, %c2_61, %c0_62, %c0_63] : memref<1x4x32x8xbf16, #tpu.memory_space<vmem>>, vector<1x1x32x8xbf16>
    %96 = vector.shape_cast %95 : vector<1x1x32x8xbf16> to vector<32x8xbf16>
    %cst_64 = arith.constant dense<0.000000e+00> : vector<8x8xf32>
    %97 = tpu.matmul %36, %96, %cst_64 {dimension_numbers = #tpu.dot_dimension_numbers<[1], [0], [0], [1], [0, 0, 1, 1], [], []>} : vector<8x32xbf16>, vector<32x8xbf16>, vector<8x8xf32> -> vector<8x8xf32>
    %98 = arith.truncf %91 : vector<8x8xf32> to vector<8x8xbf16>
    %99 = arith.truncf %94 : vector<8x8xf32> to vector<8x8xbf16>
    %cst_65 = arith.constant dense<0.000000e+00> : vector<8x8xf32>
    %100 = tpu.matmul %98, %99, %cst_65 {dimension_numbers = #tpu.dot_dimension_numbers<[1], [1], [0], [0], [0, 0, 1, 0], [], []>} : vector<8x8xbf16>, vector<8x8xbf16>, vector<8x8xf32> -> vector<8x8xf32>
    %101 = arith.addf %100, %9 : vector<8x8xf32>
    %cst_66 = arith.constant dense<0xFF800000> : vector<8xf32>
    %102 = vector.multi_reduction <maximumf>, %101, %cst_66 [1] : vector<8x8xf32> to vector<8xf32>
    %103 = vector.shape_cast %102 : vector<8xf32> to vector<8x1xf32>
    %104 = vector.broadcast %103 : vector<8x1xf32> to vector<8x8xf32>
    %105 = arith.subf %101, %104 : vector<8x8xf32>
    %106 = math.exp %105 : vector<8x8xf32>
    %cst_67 = arith.constant dense<0.000000e+00> : vector<8xf32>
    %107 = vector.multi_reduction <add>, %106, %cst_67 [1] : vector<8x8xf32> to vector<8xf32>
    %108 = vector.shape_cast %107 : vector<8xf32> to vector<8x1xf32>
    %109 = tpu.reciprocal %108 {approx = true} : vector<8x1xf32> -> vector<8x1xf32>
    %110 = vector.broadcast %109 : vector<8x1xf32> to vector<8x8xf32>
    %111 = arith.mulf %106, %110 : vector<8x8xf32>
    %112 = arith.truncf %111 : vector<8x8xf32> to vector<8x8xbf16>
    %113 = arith.truncf %97 : vector<8x8xf32> to vector<8x8xbf16>
    %cst_68 = arith.constant dense<0.000000e+00> : vector<8x8xf32>
    %114 = tpu.matmul %112, %113, %cst_68 {dimension_numbers = #tpu.dot_dimension_numbers<[1], [0], [0], [1], [0, 0, 1, 1], [], []>} : vector<8x8xbf16>, vector<8x8xbf16>, vector<8x8xf32> -> vector<8x8xf32>
    %c0_69 = arith.constant 0 : index
    %c3 = arith.constant 3 : index
    %c0_70 = arith.constant 0 : index
    %c0_71 = arith.constant 0 : index
    %115 = vector.load %arg5[%c0_69, %c3, %c0_70, %c0_71] : memref<1x4x32x8xbf16, #tpu.memory_space<vmem>>, vector<1x1x32x8xbf16>
    %116 = vector.shape_cast %115 : vector<1x1x32x8xbf16> to vector<32x8xbf16>
    %cst_72 = arith.constant dense<0.000000e+00> : vector<8x8xf32>
    %117 = tpu.matmul %36, %116, %cst_72 {dimension_numbers = #tpu.dot_dimension_numbers<[1], [0], [0], [1], [0, 0, 1, 1], [], []>} : vector<8x32xbf16>, vector<32x8xbf16>, vector<8x8xf32> -> vector<8x8xf32>
    %c0_73 = arith.constant 0 : index
    %c3_74 = arith.constant 3 : index
    %c0_75 = arith.constant 0 : index
    %c0_76 = arith.constant 0 : index
    %118 = vector.load %arg6[%c0_73, %c3_74, %c0_75, %c0_76] : memref<1x4x32x8xbf16, #tpu.memory_space<vmem>>, vector<1x1x32x8xbf16>
    %119 = vector.shape_cast %118 : vector<1x1x32x8xbf16> to vector<32x8xbf16>
    %cst_77 = arith.constant dense<0.000000e+00> : vector<8x8xf32>
    %120 = tpu.matmul %36, %119, %cst_77 {dimension_numbers = #tpu.dot_dimension_numbers<[1], [0], [0], [1], [0, 0, 1, 1], [], []>} : vector<8x32xbf16>, vector<32x8xbf16>, vector<8x8xf32> -> vector<8x8xf32>
    %c0_78 = arith.constant 0 : index
    %c3_79 = arith.constant 3 : index
    %c0_80 = arith.constant 0 : index
    %c0_81 = arith.constant 0 : index
    %121 = vector.load %arg7[%c0_78, %c3_79, %c0_80, %c0_81] : memref<1x4x32x8xbf16, #tpu.memory_space<vmem>>, vector<1x1x32x8xbf16>
    %122 = vector.shape_cast %121 : vector<1x1x32x8xbf16> to vector<32x8xbf16>
    %cst_82 = arith.constant dense<0.000000e+00> : vector<8x8xf32>
    %123 = tpu.matmul %36, %122, %cst_82 {dimension_numbers = #tpu.dot_dimension_numbers<[1], [0], [0], [1], [0, 0, 1, 1], [], []>} : vector<8x32xbf16>, vector<32x8xbf16>, vector<8x8xf32> -> vector<8x8xf32>
    %124 = arith.truncf %117 : vector<8x8xf32> to vector<8x8xbf16>
    %125 = arith.truncf %120 : vector<8x8xf32> to vector<8x8xbf16>
    %cst_83 = arith.constant dense<0.000000e+00> : vector<8x8xf32>
    %126 = tpu.matmul %124, %125, %cst_83 {dimension_numbers = #tpu.dot_dimension_numbers<[1], [1], [0], [0], [0, 0, 1, 0], [], []>} : vector<8x8xbf16>, vector<8x8xbf16>, vector<8x8xf32> -> vector<8x8xf32>
    %127 = arith.addf %126, %9 : vector<8x8xf32>
    %cst_84 = arith.constant dense<0xFF800000> : vector<8xf32>
    %128 = vector.multi_reduction <maximumf>, %127, %cst_84 [1] : vector<8x8xf32> to vector<8xf32>
    %129 = vector.shape_cast %128 : vector<8xf32> to vector<8x1xf32>
    %130 = vector.broadcast %129 : vector<8x1xf32> to vector<8x8xf32>
    %131 = arith.subf %127, %130 : vector<8x8xf32>
    %132 = math.exp %131 : vector<8x8xf32>
    %cst_85 = arith.constant dense<0.000000e+00> : vector<8xf32>
    %133 = vector.multi_reduction <add>, %132, %cst_85 [1] : vector<8x8xf32> to vector<8xf32>
    %134 = vector.shape_cast %133 : vector<8xf32> to vector<8x1xf32>
    %135 = tpu.reciprocal %134 {approx = true} : vector<8x1xf32> -> vector<8x1xf32>
    %136 = vector.broadcast %135 : vector<8x1xf32> to vector<8x8xf32>
    %137 = arith.mulf %132, %136 : vector<8x8xf32>
    %138 = arith.truncf %137 : vector<8x8xf32> to vector<8x8xbf16>
    %139 = arith.truncf %123 : vector<8x8xf32> to vector<8x8xbf16>
    %cst_86 = arith.constant dense<0.000000e+00> : vector<8x8xf32>
    %140 = tpu.matmul %138, %139, %cst_86 {dimension_numbers = #tpu.dot_dimension_numbers<[1], [0], [0], [1], [0, 0, 1, 1], [], []>} : vector<8x8xbf16>, vector<8x8xbf16>, vector<8x8xf32> -> vector<8x8xf32>
    %141 = tpu.concatenate %62, %88, %114, %140 in 1 : vector<8x8xf32>, vector<8x8xf32>, vector<8x8xf32>, vector<8x8xf32> -> vector<8x32xf32>
    %142 = arith.truncf %141 : vector<8x32xf32> to vector<8x32xbf16>
    %c0_87 = arith.constant 0 : index
    %c0_88 = arith.constant 0 : index
    %c0_89 = arith.constant 0 : index
    %143 = vector.load %arg8[%c0_87, %c0_88, %c0_89] : memref<1x32x32xbf16, #tpu.memory_space<vmem>>, vector<1x32x32xbf16>
    %144 = vector.shape_cast %143 : vector<1x32x32xbf16> to vector<32x32xbf16>
    %cst_90 = arith.constant dense<0.000000e+00> : vector<8x32xf32>
    %145 = tpu.matmul %142, %144, %cst_90 {dimension_numbers = #tpu.dot_dimension_numbers<[1], [0], [0], [1], [0, 0, 1, 1], [], []>} : vector<8x32xbf16>, vector<32x32xbf16>, vector<8x32xf32> -> vector<8x32xf32>
    %c0_91 = arith.constant 0 : index
    %c0_92 = arith.constant 0 : index
    %c0_93 = arith.constant 0 : index
    %146 = vector.load %arg9[%c0_91, %c0_92, %c0_93] : memref<1x1x32xf32, #tpu.memory_space<vmem>>, vector<1x1x32xf32>
    %147 = vector.shape_cast %146 : vector<1x1x32xf32> to vector<1x32xf32>
    %148 = vector.broadcast %147 : vector<1x32xf32> to vector<8x32xf32>
    %149 = arith.addf %145, %148 : vector<8x32xf32>
    %150 = arith.addf %3, %149 : vector<8x32xf32>
    %c0_94 = arith.constant 0 : index
    %c0_95 = arith.constant 0 : index
    %c0_96 = arith.constant 0 : index
    %151 = vector.load %arg10[%c0_94, %c0_95, %c0_96] : memref<1x1x32xf32, #tpu.memory_space<vmem>>, vector<1x1x32xf32>
    %152 = vector.shape_cast %151 : vector<1x1x32xf32> to vector<1x32xf32>
    %c0_97 = arith.constant 0 : index
    %c0_98 = arith.constant 0 : index
    %c0_99 = arith.constant 0 : index
    %153 = vector.load %arg11[%c0_97, %c0_98, %c0_99] : memref<1x1x32xf32, #tpu.memory_space<vmem>>, vector<1x1x32xf32>
    %154 = vector.shape_cast %153 : vector<1x1x32xf32> to vector<1x32xf32>
    %cst_100 = arith.constant dense<0.000000e+00> : vector<8xf32>
    %155 = vector.multi_reduction <add>, %150, %cst_100 [1] : vector<8x32xf32> to vector<8xf32>
    %156 = vector.shape_cast %155 : vector<8xf32> to vector<8x1xf32>
    %cst_101 = arith.constant 3.200000e+01 : f32
    %157 = vector.broadcast %cst_101 : f32 to vector<8x1xf32>
    %158 = arith.divf %156, %157 : vector<8x1xf32>
    %159 = vector.broadcast %158 : vector<8x1xf32> to vector<8x32xf32>
    %160 = arith.subf %150, %159 : vector<8x32xf32>
    %161 = arith.mulf %160, %160 : vector<8x32xf32>
    %cst_102 = arith.constant dense<0.000000e+00> : vector<8xf32>
    %162 = vector.multi_reduction <add>, %161, %cst_102 [1] : vector<8x32xf32> to vector<8xf32>
    %163 = vector.shape_cast %162 : vector<8xf32> to vector<8x1xf32>
    %cst_103 = arith.constant 3.200000e+01 : f32
    %164 = vector.broadcast %cst_103 : f32 to vector<8x1xf32>
    %165 = arith.divf %163, %164 : vector<8x1xf32>
    %166 = vector.broadcast %158 : vector<8x1xf32> to vector<8x32xf32>
    %167 = arith.subf %150, %166 : vector<8x32xf32>
    %cst_104 = arith.constant 9.99999974E-6 : f32
    %168 = vector.broadcast %cst_104 : f32 to vector<8x1xf32>
    %169 = arith.addf %165, %168 : vector<8x1xf32>
    %170 = math.rsqrt %169 : vector<8x1xf32>
    %171 = vector.broadcast %170 : vector<8x1xf32> to vector<8x32xf32>
    %172 = arith.mulf %167, %171 : vector<8x32xf32>
    %173 = vector.broadcast %152 : vector<1x32xf32> to vector<8x32xf32>
    %174 = arith.mulf %172, %173 : vector<8x32xf32>
    %175 = vector.broadcast %154 : vector<1x32xf32> to vector<8x32xf32>
    %176 = arith.addf %174, %175 : vector<8x32xf32>
    %177 = arith.truncf %176 : vector<8x32xf32> to vector<8x32xbf16>
    %c0_105 = arith.constant 0 : index
    %c0_106 = arith.constant 0 : index
    %c0_107 = arith.constant 0 : index
    %178 = vector.load %arg12[%c0_105, %c0_106, %c0_107] : memref<1x32x128xbf16, #tpu.memory_space<vmem>>, vector<1x32x128xbf16>
    %179 = vector.shape_cast %178 : vector<1x32x128xbf16> to vector<32x128xbf16>
    %cst_108 = arith.constant dense<0.000000e+00> : vector<8x128xf32>
    %180 = tpu.matmul %177, %179, %cst_108 {dimension_numbers = #tpu.dot_dimension_numbers<[1], [0], [0], [1], [0, 0, 1, 1], [], []>} : vector<8x32xbf16>, vector<32x128xbf16>, vector<8x128xf32> -> vector<8x128xf32>
    %c0_109 = arith.constant 0 : index
    %c0_110 = arith.constant 0 : index
    %c0_111 = arith.constant 0 : index
    %181 = vector.load %arg13[%c0_109, %c0_110, %c0_111] : memref<1x1x128xf32, #tpu.memory_space<vmem>>, vector<1x1x128xf32>
    %182 = vector.shape_cast %181 : vector<1x1x128xf32> to vector<1x128xf32>
    %183 = vector.broadcast %182 : vector<1x128xf32> to vector<8x128xf32>
    %184 = arith.addf %180, %183 : vector<8x128xf32>
    %cst_112 = arith.constant 5.000000e-01 : f32
    %185 = vector.broadcast %cst_112 : f32 to vector<8x128xf32>
    %186 = arith.mulf %185, %184 : vector<8x128xf32>
    %cst_113 = arith.constant 0.636619746 : f32
    %187 = math.sqrt %cst_113 : f32
    %188 = arith.mulf %184, %184 : vector<8x128xf32>
    %189 = arith.mulf %184, %188 : vector<8x128xf32>
    %cst_114 = arith.constant 4.471500e-02 : f32
    %190 = vector.broadcast %cst_114 : f32 to vector<8x128xf32>
    %191 = arith.mulf %190, %189 : vector<8x128xf32>
    %192 = arith.addf %184, %191 : vector<8x128xf32>
    %193 = vector.broadcast %187 : f32 to vector<8x128xf32>
    %194 = arith.mulf %193, %192 : vector<8x128xf32>
    %195 = math.tanh %194 : vector<8x128xf32>
    %cst_115 = arith.constant 1.000000e+00 : f32
    %196 = vector.broadcast %cst_115 : f32 to vector<8x128xf32>
    %197 = arith.addf %196, %195 : vector<8x128xf32>
    %198 = arith.mulf %186, %197 : vector<8x128xf32>
    %199 = arith.truncf %198 : vector<8x128xf32> to vector<8x128xbf16>
    %c0_116 = arith.constant 0 : index
    %c0_117 = arith.constant 0 : index
    %c0_118 = arith.constant 0 : index
    %200 = vector.load %arg14[%c0_116, %c0_117, %c0_118] : memref<1x128x32xbf16, #tpu.memory_space<vmem>>, vector<1x128x32xbf16>
    %201 = vector.shape_cast %200 : vector<1x128x32xbf16> to vector<128x32xbf16>
    %cst_119 = arith.constant dense<0.000000e+00> : vector<8x32xf32>
    %202 = tpu.matmul %199, %201, %cst_119 {dimension_numbers = #tpu.dot_dimension_numbers<[1], [0], [0], [1], [0, 0, 1, 1], [], []>} : vector<8x128xbf16>, vector<128x32xbf16>, vector<8x32xf32> -> vector<8x32xf32>
    %203 = arith.addf %150, %202 : vector<8x32xf32>
    %c0_120 = arith.constant 0 : index
    %c0_121 = arith.constant 0 : index
    %c0_122 = arith.constant 0 : index
    %204 = vector.load %arg15[%c0_120, %c0_121, %c0_122] : memref<1x1x32xf32, #tpu.memory_space<vmem>>, vector<1x1x32xf32>
    %205 = vector.shape_cast %204 : vector<1x1x32xf32> to vector<1x32xf32>
    %206 = vector.broadcast %205 : vector<1x32xf32> to vector<8x32xf32>
    %207 = arith.addf %203, %206 : vector<8x32xf32>
    %c0_123 = arith.constant 0 : index
    %c0_124 = arith.constant 0 : index
    %208 = vector.load %arg20[%c0_123, %c0_124] : memref<8x32xf32, #tpu.memory_space<vmem>>, vector<8x32xf32>
    tpu.vector_store %arg20[%c0_123, %c0_124], %207 {strides = array<i32>} : memref<8x32xf32, #tpu.memory_space<vmem>>, vector<8x32xf32>,
    %c1_i32 = arith.constant 1 : i32
    %209 = arith.cmpi eq, %arg1, %c1_i32 : i32
    %210 = arith.extui %209 : i1 to i32
    %c0_i32_125 = arith.constant 0 : i32
    %211 = arith.cmpi ne, %210, %c0_i32_125 : i32
    scf.if %211 {
      %c0_126 = arith.constant 0 : index
      %c0_127 = arith.constant 0 : index
      %212 = vector.load %arg16[%c0_126, %c0_127] : memref<1x32xf32, #tpu.memory_space<vmem>>, vector<1x32xf32>
      %c0_128 = arith.constant 0 : index
      %c0_129 = arith.constant 0 : index
      %213 = vector.load %arg17[%c0_128, %c0_129] : memref<1x32xf32, #tpu.memory_space<vmem>>, vector<1x32xf32>
      %cst_130 = arith.constant dense<0.000000e+00> : vector<8xf32>
      %214 = vector.multi_reduction <add>, %207, %cst_130 [1] : vector<8x32xf32> to vector<8xf32>
      %215 = vector.shape_cast %214 : vector<8xf32> to vector<8x1xf32>
      %cst_131 = arith.constant 3.200000e+01 : f32
      %216 = vector.broadcast %cst_131 : f32 to vector<8x1xf32>
      %217 = arith.divf %215, %216 : vector<8x1xf32>
      %218 = vector.broadcast %217 : vector<8x1xf32> to vector<8x32xf32>
      %219 = arith.subf %207, %218 : vector<8x32xf32>
      %220 = arith.mulf %219, %219 : vector<8x32xf32>
      %cst_132 = arith.constant dense<0.000000e+00> : vector<8xf32>
      %221 = vector.multi_reduction <add>, %220, %cst_132 [1] : vector<8x32xf32> to vector<8xf32>
      %222 = vector.shape_cast %221 : vector<8xf32> to vector<8x1xf32>
      %cst_133 = arith.constant 3.200000e+01 : f32
      %223 = vector.broadcast %cst_133 : f32 to vector<8x1xf32>
      %224 = arith.divf %222, %223 : vector<8x1xf32>
      %225 = vector.broadcast %217 : vector<8x1xf32> to vector<8x32xf32>
      %226 = arith.subf %207, %225 : vector<8x32xf32>
      %cst_134 = arith.constant 9.99999974E-6 : f32
      %227 = vector.broadcast %cst_134 : f32 to vector<8x1xf32>
      %228 = arith.addf %224, %227 : vector<8x1xf32>
      %229 = math.rsqrt %228 : vector<8x1xf32>
      %230 = vector.broadcast %229 : vector<8x1xf32> to vector<8x32xf32>
      %231 = arith.mulf %226, %230 : vector<8x32xf32>
      %232 = vector.broadcast %212 : vector<1x32xf32> to vector<8x32xf32>
      %233 = arith.mulf %231, %232 : vector<8x32xf32>
      %234 = vector.broadcast %213 : vector<1x32xf32> to vector<8x32xf32>
      %235 = arith.addf %233, %234 : vector<8x32xf32>
      %236 = arith.truncf %235 : vector<8x32xf32> to vector<8x32xbf16>
      %c0_135 = arith.constant 0 : index
      %c0_136 = arith.constant 0 : index
      %237 = vector.load %arg18[%c0_135, %c0_136] : memref<32x128xbf16, #tpu.memory_space<vmem>>, vector<32x128xbf16>
      %cst_137 = arith.constant dense<0.000000e+00> : vector<8x128xf32>
      %238 = tpu.matmul %236, %237, %cst_137 {dimension_numbers = #tpu.dot_dimension_numbers<[1], [0], [0], [1], [0, 0, 1, 1], [], []>} : vector<8x32xbf16>, vector<32x128xbf16>, vector<8x128xf32> -> vector<8x128xf32>
      %c0_138 = arith.constant 0 : index
      %c0_139 = arith.constant 0 : index
      %239 = vector.load %arg19[%c0_138, %c0_139] : memref<8x128xf32, #tpu.memory_space<vmem>>, vector<8x128xf32>
      tpu.vector_store %arg19[%c0_138, %c0_139], %238 {strides = array<i32>} : memref<8x128xf32, #tpu.memory_space<vmem>>, vector<8x128xf32>,
    } else {
    }
    return
  }
  func.func @transform_0(%arg0: i32, %arg1: i32) -> (i32, i32) {
    %c0_i32 = arith.constant 0 : i32
    %c0_i32_0 = arith.constant 0 : i32
    return %arg0, %c0_i32 : i32, i32
  }
  func.func @transform_1(%arg0: i32, %arg1: i32) -> (i32, i32, i32) {
    %c0_i32 = arith.constant 0 : i32
    %c0_i32_0 = arith.constant 0 : i32
    %c0_i32_1 = arith.constant 0 : i32
    return %arg1, %c0_i32, %c0_i32_0 : i32, i32, i32
  }
  func.func @transform_2(%arg0: i32, %arg1: i32) -> (i32, i32, i32) {
    %c0_i32 = arith.constant 0 : i32
    %c0_i32_0 = arith.constant 0 : i32
    %c0_i32_1 = arith.constant 0 : i32
    return %arg1, %c0_i32, %c0_i32_0 : i32, i32, i32
  }
  func.func @transform_3(%arg0: i32, %arg1: i32) -> (i32, i32, i32, i32) {
    %c0_i32 = arith.constant 0 : i32
    %c0_i32_0 = arith.constant 0 : i32
    %c0_i32_1 = arith.constant 0 : i32
    %c0_i32_2 = arith.constant 0 : i32
    return %arg1, %c0_i32, %c0_i32_0, %c0_i32_1 : i32, i32, i32, i32
  }
  func.func @transform_4(%arg0: i32, %arg1: i32) -> (i32, i32, i32, i32) {
    %c0_i32 = arith.constant 0 : i32
    %c0_i32_0 = arith.constant 0 : i32
    %c0_i32_1 = arith.constant 0 : i32
    %c0_i32_2 = arith.constant 0 : i32
    return %arg1, %c0_i32, %c0_i32_0, %c0_i32_1 : i32, i32, i32, i32
  }
  func.func @transform_5(%arg0: i32, %arg1: i32) -> (i32, i32, i32, i32) {
    %c0_i32 = arith.constant 0 : i32
    %c0_i32_0 = arith.constant 0 : i32
    %c0_i32_1 = arith.constant 0 : i32
    %c0_i32_2 = arith.constant 0 : i32
    return %arg1, %c0_i32, %c0_i32_0, %c0_i32_1 : i32, i32, i32, i32
  }
  func.func @transform_6(%arg0: i32, %arg1: i32) -> (i32, i32, i32) {
    %c0_i32 = arith.constant 0 : i32
    %c0_i32_0 = arith.constant 0 : i32
    %c0_i32_1 = arith.constant 0 : i32
    return %arg1, %c0_i32, %c0_i32_0 : i32, i32, i32
  }
  func.func @transform_7(%arg0: i32, %arg1: i32) -> (i32, i32, i32) {
    %c0_i32 = arith.constant 0 : i32
    %c0_i32_0 = arith.constant 0 : i32
    %c0_i32_1 = arith.constant 0 : i32
    return %arg1, %c0_i32, %c0_i32_0 : i32, i32, i32
  }
  func.func @transform_8(%arg0: i32, %arg1: i32) -> (i32, i32, i32) {
    %c0_i32 = arith.constant 0 : i32
    %c0_i32_0 = arith.constant 0 : i32
    %c0_i32_1 = arith.constant 0 : i32
    return %arg1, %c0_i32, %c0_i32_0 : i32, i32, i32
  }
  func.func @transform_9(%arg0: i32, %arg1: i32) -> (i32, i32, i32) {
    %c0_i32 = arith.constant 0 : i32
    %c0_i32_0 = arith.constant 0 : i32
    %c0_i32_1 = arith.constant 0 : i32
    return %arg1, %c0_i32, %c0_i32_0 : i32, i32, i32
  }
  func.func @transform_10(%arg0: i32, %arg1: i32) -> (i32, i32, i32) {
    %c0_i32 = arith.constant 0 : i32
    %c0_i32_0 = arith.constant 0 : i32
    %c0_i32_1 = arith.constant 0 : i32
    return %arg1, %c0_i32, %c0_i32_0 : i32, i32, i32
  }
  func.func @transform_11(%arg0: i32, %arg1: i32) -> (i32, i32, i32) {
    %c0_i32 = arith.constant 0 : i32
    %c0_i32_0 = arith.constant 0 : i32
    %c0_i32_1 = arith.constant 0 : i32
    return %arg1, %c0_i32, %c0_i32_0 : i32, i32, i32
  }
  func.func @transform_12(%arg0: i32, %arg1: i32) -> (i32, i32, i32) {
    %c0_i32 = arith.constant 0 : i32
    %c0_i32_0 = arith.constant 0 : i32
    %c0_i32_1 = arith.constant 0 : i32
    return %arg1, %c0_i32, %c0_i32_0 : i32, i32, i32
  }
  func.func @transform_13(%arg0: i32, %arg1: i32) -> (i32, i32, i32) {
    %c0_i32 = arith.constant 0 : i32
    %c0_i32_0 = arith.constant 0 : i32
    %c0_i32_1 = arith.constant 0 : i32
    return %arg1, %c0_i32, %c0_i32_0 : i32, i32, i32
  }
  func.func @transform_14(%arg0: i32, %arg1: i32) -> (i32, i32) {
    %c0_i32 = arith.constant 0 : i32
    %c0_i32_0 = arith.constant 0 : i32
    %c0_i32_1 = arith.constant 0 : i32
    return %c0_i32, %c0_i32_0 : i32, i32
  }
  func.func @transform_15(%arg0: i32, %arg1: i32) -> (i32, i32) {
    %c0_i32 = arith.constant 0 : i32
    %c0_i32_0 = arith.constant 0 : i32
    %c0_i32_1 = arith.constant 0 : i32
    return %c0_i32, %c0_i32_0 : i32, i32
  }
  func.func @transform_16(%arg0: i32, %arg1: i32) -> (i32, i32) {
    %c0_i32 = arith.constant 0 : i32
    %c0_i32_0 = arith.constant 0 : i32
    %c0_i32_1 = arith.constant 0 : i32
    return %c0_i32, %c0_i32_0 : i32, i32
  }
  func.func @transform_17(%arg0: i32, %arg1: i32) -> (i32, i32) {
    %c0_i32 = arith.constant 0 : i32
    %c0_i32_0 = arith.constant 0 : i32
    return %arg0, %c0_i32 : i32, i32
  }
}

</mosaic_0001>

<bundles_post_ra>
// kernel: tpu_custom_call.1
= control target key start
LH: loop header
LB: loop body
LE: loop exit
PB: predicated region body
PF: predicated region fallthrough
CT: control target
= control target key end

     0   :  { %s3743_s0 = inlined_call_operand.vmem [shape: f32[16,32], index: 0, kind: input, shape index: {}]   ;;  %s3744_s1 = inlined_call_operand.vmem [shape: f32[2,1,32], index: 1, kind: input, shape index: {}]   ;;  %s3745_s2 = inlined_call_operand.vmem [shape: f32[2,1,32], index: 2, kind: input, shape index: {}]   ;;  %s3746_s3 = inlined_call_operand.vmem [shape: bf16[2,4,32,8], index: 3, kind: input, shape index: {}]   ;;  %s3747_s4 = inlined_call_operand.vmem [shape: bf16[2,4,32,8], index: 4, kind: input, shape index: {}]   ;;  %s3748_s5 = inlined_call_operand.vmem [shape: bf16[2,4,32,8], index: 5, kind: input, shape index: {}]   ;;  %s3749_s6 = inlined_call_operand.vmem [shape: bf16[2,32,32], index: 6, kind: input, shape index: {}]   ;;  %s3750_s7 = inlined_call_operand.vmem [shape: f32[2,1,32], index: 7, kind: input, shape index: {}]   ;;  %s3751_s8 = inlined_call_operand.vmem [shape: f32[2,1,32], index: 8, kind: input, shape index: {}]   ;;  %s3752_s9 = inlined_call_operand.vmem [shape: f32[2,1,32], index: 9, kind: input, shape index: {}]   ;;  %s3753_s10 = inlined_call_operand.vmem [shape: bf16[2,32,128], index: 10, kind: input, shape index: {}]   ;;  %s3754_s11 = inlined_call_operand.vmem [shape: f32[2,1,128], index: 11, kind: input, shape index: {}]   ;;  %s3755_s12 = inlined_call_operand.vmem [shape: bf16[2,128,32], index: 12, kind: input, shape index: {}]   ;;  %s3756_s13 = inlined_call_operand.vmem [shape: f32[2,1,32], index: 13, kind: input, shape index: {}]   ;;  %s3757_s14 = inlined_call_operand.vmem [shape: f32[1,32], index: 14, kind: input, shape index: {}]   ;;  %s3758_s15 = inlined_call_operand.vmem [shape: f32[1,32], index: 15, kind: input, shape index: {}]   ;;  %s3759_s16 = inlined_call_operand.vmem [shape: bf16[32,128], index: 16, kind: input, shape index: {}]   ;;  %s3760_s17 = inlined_call_operand.hbm [shape: f32[16,128], index: 17, kind: output, shape index: {}]  }
   0x1   :  { %3778 = sst [smem:[#allocation20_spill]] %s3743_s0 }
   0x2   :  { %3779 = sst [smem:[#allocation21_spill]] %s3744_s1 }
   0x3   :  { %3780 = sst [smem:[#allocation22_spill]] %s3746_s3 }
   0x4   :  { %3781 = sst [smem:[#allocation23_spill]] %s3747_s4 }
   0x5   :  { %3782 = sst [smem:[#allocation24_spill]] %s3748_s5 }
   0x6   :  { %3783 = sst [smem:[#allocation25_spill]] %s3749_s6 }
   0x7   :  { %3784 = sst [smem:[#allocation26_spill]] %s3756_s13 }
   0x8   :  { %3785 = sst [smem:[#allocation27_spill]] %s3757_s14 }
   0x9   :  { %3786 = sst [smem:[#allocation28_spill]] %s3758_s15 }
   0xa   :  { %3787 = sst [smem:[#allocation29_spill]] %s3759_s16 }
   0xb   :  { %3788 = sst [smem:[#allocation30_spill]] %s3760_s17 }
   0xc   :  { %22 = vsyncpa [#allocation4], 0 }
   0xd   :  { %24 = vsyncpa [#allocation4 + $0x1], 0  ;;  %s3284_s24 = smov 0   ;;  %s3286_s25 = smov 0  }
   0xe   :  { %s3288_s26 = smov 0   ;;  %s3290_s27 = smov 0  }
   0xf   :  { %s3292_s28 = smov 0   ;;  %s3294_s29 = smov 0  }
  0x10   :  { %s3296_s0 = smov 0   ;;  %s3298_s30 = smov 0  }
  0x11 LB: > { %3789 = sst [smem:[#allocation6_spill]] %s3155_s24  ;;  %s2553_s18 = sadd.s32 4294967295, %s3183_s30   ;;  %s3183_s30 = sphi %s3298_s30, %s30_s30   ;;  %s3179_s0 = sphi %s3296_s0, %s3838_s0   ;;  %s3175_s29 = sphi %s3294_s29, %s3837_s29   ;;  %s3171_s28 = sphi %s3292_s28, %s3836_s28   ;;  %s3167_s27 = sphi %s3290_s27, %s3835_s27   ;;  %s3163_s26 = sphi %s3288_s26, %s3834_s26   ;;  %s3159_s25 = sphi %s3286_s25, %s3833_s25   ;;  %s3155_s24 = sphi %s3284_s24, %s3832_s24  }
  0x12   : > { %3790 = sst [smem:[#allocation7_spill]] %s3159_s25  ;;  %s2554_s19 = sadd.s32 4294967294, %s3183_s30  }
  0x13   : > { %3791 = sst [smem:[#allocation8_spill]] %s3163_s26  ;;  %s39_s1 = sadd.s32 1, %s3175_s29 }
  0x14   : > { %3792 = sst [smem:[#allocation9_spill]] %s3167_s27  ;;  %p40_p0 = scmp.ge.s32.totalorder %s39_s1, 2 }
  0x15   : > { %3793 = sst [smem:[#allocation10_spill]] %s3171_s28  ;;  %s42_s20 = sadd.s32 1, %s3179_s0 }
  0x16   : > { %3794 = sst [smem:[#allocation11_spill]] %s3175_s29  ;;  %p486_p1 = scmp.ne.s32.totalorder %s3163_s26, %s3159_s25 }
  0x17   : > { %3795 = sst [smem:[#allocation12_spill]] %s3179_s0  ;;  %p487_p2 = scmp.eq.s32.totalorder %s2553_s18, 3 }
  0x18   : > { %3796 = sst [smem:[#allocation13_spill]] %s3183_s30  ;;  %s3840_s1 = smov (%p40_p0, %s39_s1), 0 }
  0x19   : > { %3797 = sst [smem:[#allocation14_spill]] %s3840_s1  ;;  %s3842_s20 = smov (!%p40_p0, %s42_s20), %s3179_s0 }
  0x1a   : > { %p3333_p3 = por %p487_p2, %p486_p1  ;;  %p492_p4 = scmp.ne.s32.totalorder %s3159_s25, %s3155_s24 }
  0x1b   : > { %p44_p5 = scmp.ge.s32.totalorder %s3842_s20, 2  ;;  %p493_p6 = scmp.eq.s32.totalorder %s2554_s19, 3 }
  0x1c   : > { %s3798_s21 = scalar_select %p3333_p3, 1, 0 }
  0x1d   : > { %p2557_p7 = scmp.ge.s32.totalorder %s3183_s30, 1  ;;  %p617_p8 = scmp.lt.s32.totalorder %s3183_s30, 5 }
  0x1e   : > { %3799 = sst [smem:[#allocation15_spill]] %s3798_s21  ;;  %s3844_s20 = smov (%p44_p5, %s3842_s20), 0 }
  0x1f   : > { %3800 = sst [smem:[#allocation16_spill]] %s3844_s20  ;;  %p3343_p9 = por %p493_p6, %p492_p4 }
  0x20   : > { %p618_p10 = pnand %p2557_p7, %p617_p8  ;;  %s473_s23 = ssub.s32 %s3179_s0, %s3844_s20 }
  0x21   : > { %s3801_s22 = scalar_select %p3343_p9, 1, 0 }
  0x22   : > { %s476_s18 = sadd.s32 1, %s3163_s26  ;;  %p474_p11 = scmp.eq.s32.totalorder %s473_s23, 0 }
  0x23   : > { %3802 = sst [smem:[#allocation17_spill]] %s3801_s22  ;;  %621 = sbr.rel (%p618_p10) target bundleno = 5295 (0x14af), region = 88 }
  0x24   : > { %s3351_s1 = scalar_select %p474_p11, %s3163_s26, %s476_s18  }
  0x26   : > { %3803 = sst [smem:[#allocation18_spill]] %s3351_s1 }
  0x2a   : > { %s3766_s19 = sand.u32 1, %s3159_s25   ;;  %p719_p12 = scmp.lt.s32.totalorder %s3171_s28, 1 }
  0x2b   : > { %s3357_s29 = sshll.u32 %s3766_s19, 3  ;;  %p723_p13 = scmp.lt.s32.totalorder %s3167_s27, 1 }
  0x2c   : > { %s720_s22 = scalar_select %p719_p12, %s3171_s28, 1 }
  0x2d   : > { %s3362_s24 = scalar_select %p723_p13, %s3167_s27, 1 }
  0x2e   : > { %s2559_s23 = sshll.u32 %s720_s22, 3  ;;  %s3804_s0 = sld [smem:[#allocation20_spill]] }
  0x2f   : > { %s2684_s15 = sshll.u32 %s3362_s24, 6  ;;  %s3806_s3 = sld [smem:[#allocation22_spill]] }
  0x30   : > { %s3807_s4 = sld [smem:[#allocation23_spill]]  ;;  %s3808_s5 = sld [smem:[#allocation24_spill]] }
  0x31   : > { %s2687_s30 = sshll.u32 %s3362_s24, 4  ;;  %s3809_s6 = sld [smem:[#allocation25_spill]] }
  0x32   : > { %s3421_s14 = scalar_lea.vmem %s3755_s12, %s2684_s15  ;;  %s3811_s13 = sld [smem:[#allocation26_spill]] }
  0x33   : > { %s3812_s22 = sld [smem:[#allocation9_spill]] }
  0x34   : > { %s722_s1 = scalar_lea.vmem %s3804_s0, %s2559_s23  ;;  %s757_s0 = scalar_lea.vmem %s3752_s9, %s3362_s24 }
  0x35   : > { %s3379_s27 = scalar_lea.vmem %s3806_s3, %s2684_s15  ;;  %s718_s3 = scalar_lea.vmem [#allocation3], %s3357_s29 }
  0x36   : > { %s3384_s20 = scalar_lea.vmem %s3807_s4, %s2684_s15  ;;  %s3389_s26 = scalar_lea.vmem %s3808_s5, %s2684_s15 }
  0x37   : > { %s3395_s21 = scalar_lea.vmem %s3809_s6, %s2687_s30  ;;  %s3412_s5 = scalar_lea.vmem %s3753_s10, %s2687_s30 }
  0x38   : > { %3810 = sst [smem:[#allocation19_spill]] %s3395_s21  ;;  %s765_s6 = scalar_lea.vmem %s3754_s11, %s3362_s24 }
  0x39   : > { %s773_s16 = scalar_lea.vmem %s3811_s13, %s3362_s24  ;;  %p2572_p0 = scmp.ne.s32.totalorder %s3812_s22, 0 }
  0x3a   : > { %v779_v0 = vld [vmem:[%s722_s1] sm:$0xff] (!%p2572_p0)  ;;  %vm780_vm0 = vcmask (!%p2572_p0), 261120  }
  0x3b   : > { %778 = sbr.rel (%p2572_p0) target bundleno = 66 (0x42), region = 92  ;;  %781 = vst.msk [vmem:[#allocation2] sm:$0xff] (!%p2572_p0), %vm780_vm0, %v779_v0 }
  0x42 PF: > { %v3429_v1 = vld [vmem:[#allocation2] sm:$0xff]  ;;  %vm791_vm1 = vcmask 261120   ;;  %v3185_v9 = vmov 0.0   ;;  %v3028_v10 = vld [vmem:[%s3379_s27 + $0x8] sm:$0xff]   ;;  %vm3186_vm2 = vmmov 0   ;;  %s3813_s1 = sld [smem:[#allocation21_spill]]  ;;  %s3815_s23 = scalar_lea.vmem %s3745_s2, %s3362_s24  ;;  %v783_v46 = vlaneseq }
  0x43   : > { %v792_v2 = vsel %vm791_vm1, %v3429_v1, 0.0  ;;  %v3027_v8 = vld [vmem:[%s3379_s27] sm:$0xff]   ;;  %2760 = vmatprep.subr.bf16.mxu1 %v3185_v9  ;;  %2790 = vmatprep.subr.bf16.mxu0 %v3185_v9  ;;  %v3030_v22 = vld [vmem:[%s3384_s20 + $0x8] sm:$0xff]   ;;  %vm994_vm3 = vcmask 64512   ;;  %vm1057_vm4 = vcmask 1043456   ;;  %v3033_v36 = vld [vmem:[%s3379_s27 + $0x10] sm:$0xff]   ;;  %s3817_s17 = scalar_lea.vmem %s3750_s7, %s3362_s24  ;;  %s3818_s4 = scalar_lea.vmem %s3751_s8, %s3362_s24 }
  0x44   : > { %793 = vadd.xlane.f32.xlu0 %v792_v2  ;;  %2761 = vmatpush3.bf16.msra.mxu1 %v3027_v8  ;;  %v2574_v17 = vld [vmem:[%s3815_s23] ss:$0 sm:$0xff]  ;;  %v3032_v24 = vld [vmem:[%s3389_s26 + $0x8] sm:$0xff]   ;;  %v3034_v43 = vld [vmem:[%s3379_s27 + $0x18] sm:$0xff]   ;;  %v784_v47 = vshrl.u32 %v783_v46, 7  ;;  %v786_v48 = vand.u32 127, %v783_v46 }
  0x45   : > { %2762 = vmatprep.subr.bf16.mxu1 %v3185_v9  ;;  %2764 = vmatprep.mubr.msk.bf16.mxu1 %vm3186_vm2, %v3185_v9  ;;  %v3029_v20 = vld [vmem:[%s3384_s20] sm:$0xff]   ;;  %v3035_v44 = vld [vmem:[%s3389_s26 + $0x10] sm:$0xff]   ;;  %v3036_v45 = vld [vmem:[%s3389_s26 + $0x18] sm:$0xff]   ;;  %v3187_v49 = vmov -1e+30   ;;  %s3190_s19 = smov 24  }
  0x46   : > { %2792 = vmatprep.mubr.msk.bf16.mxu0 %vm3186_vm2, %v3185_v9  ;;  %v3031_v23 = vld [vmem:[%s3389_s26] sm:$0xff]   ;;  %vm787_vm5 = vcmp.le.s32.totalorder %v786_v48, %v784_v47  ;;  %vm1948_vm6 = vcmask 130048   ;;  %vm1950_vm7 = vcmask 195584   ;;  %s3820_s21 = sld [smem:[#allocation9_spill]] }
  0x47   : > { %v3500_v50 = vsel %vm787_vm5, 0.0, %v3187_v49 }
  0x48   : > { %2763 = vmatpush3.bf16.msra.mxu1 %v3028_v10  ;;  %s3814_s30 = scalar_lea.vmem %s3813_s1, %s3362_s24 }
  0x49   : > { %2768 = vmatprep.subr.bf16.mxu1 %v3185_v9  ;;  %v2573_v15 = vld [vmem:[%s3814_s30] ss:$0 sm:$0xff] }
  0x4c   : > { %p2674_p1 = scmp.ne.s32.totalorder %s3820_s21, 1 }
  0x4d   : > { %s3821_s13 = sld [smem:[#allocation29_spill]] (!%p2674_p1)  ;;  %vm3192_vm8 = vmmov (!%p2674_p1), 0  }
  0xd1   : > { %v794_v3 = vpop.xlane.xlu0 %793 }
  0xd2   : > { %v796_v4 = vmul.f32 0.03125, %v794_v3 }
  0xd4   : > { %v797_v5 = vsub.f32 %v3429_v1, %v796_v4 }
  0xd6   : > { %v798_v6 = vmul.f32 %v797_v5, %v797_v5 }
  0xd8   : > { %v799_v7 = vsel %vm791_vm1, %v798_v6, 0.0 }
  0xd9   : > { %800 = vadd.xlane.f32.xlu0 %v799_v7 }
 0x166   : > { %v801_v11 = vpop.xlane.xlu0 %800 }
 0x167   : > { %v802_v12 = vmul.f32 0.03125, %v801_v11 }
 0x169   : > { %v803_v13 = vadd.f32 1e-05, %v802_v12 }
 0x16b   : > { %3063 = vrsqrt.f32 %v803_v13  ;;  %v3037_v13 = vld [vmem:[%s3384_s20 + $0x10] sm:$0xff]  }
 0x175   : > { %v3064_v14 = vpop.eup %3063 }
 0x176   : > { %v805_v16 = vmul.f32 %v3064_v14, %v797_v5 }
 0x178   : > { %v812_v18 = vmul.f32 %v2573_v15, %v805_v16  ;;  %v3038_v15 = vld [vmem:[%s3384_s20 + $0x18] sm:$0xff]  }
 0x17a   : > { %v819_v19 = vadd.f32 %v2574_v17, %v812_v18 }
 0x17c   : > { %v3456_v21 = vpack.c.bf16 %v819_v19, %v819_v19 }
 0x17e   : > { %2765 = vmatmul.mubr.msk.bf16.vlgmr.msra.gmra.mrb[0].mxu1 %vm791_vm1, %v3456_v21 }
 0x17f   : > { %2769 = vmatpush3.bf16.msra.mxu1 %v3029_v20  ;;  %2772 = vmatprep.mubr.msk.bf16.mxu1 %vm3186_vm2, %v3185_v9 }
 0x180   : > { %2770 = vmatprep.subr.bf16.mxu1 %v3185_v9 }
 0x183   : > { %2771 = vmatpush3.bf16.msra.mxu1 %v3030_v22 }
 0x184   : > { %2776 = vmatprep.subr.bf16.mxu1 %v3185_v9 }
 0x186   : > { %2773 = vmatmul.mubr.msk.bf16.vlgmr.msra.gmra.mrb[4].mxu1 %vm791_vm1, %v3456_v21 }
 0x187   : > { %2777 = vmatpush3.bf16.msra.mxu1 %v3031_v23  ;;  %2780 = vmatprep.mubr.msk.bf16.mxu1 %vm3186_vm2, %v3185_v9 }
 0x188   : > { %2778 = vmatprep.subr.bf16.mxu1 %v3185_v9 }
 0x18b   : > { %2779 = vmatpush3.bf16.msra.mxu1 %v3032_v24 }
 0x18c   : > { %2784 = vmatprep.subr.bf16.mxu1 %v3185_v9 }
 0x18e   : > { %2781 = vmatmul.mubr.msk.bf16.vlgmr.msra.gmra.mrb[8].mxu1 %vm791_vm1, %v3456_v21 }
 0x18f   : > { %2786 = vmatprep.mubr.msk.bf16.mxu1 %vm3186_vm2, %v3185_v9 }
 0x251   : > { %v874_v25 = vpop.f32.mrb[0].mxu1 }
 0x252   : > { %v2766_v26 = vpop.f32.mrb[1].mxu1  ;;  %v992_v37 = vpack.c.bf16 %v874_v25, %v874_v25 }
 0x253   : > { %v877_v27 = vpop.f32.mrb[2].mxu1 }
 0x254   : > { %v2767_v28 = vpop.f32.mrb[3].mxu1  ;;  %v3039_v27 = vld [vmem:[%s3379_s27 + $0x20] sm:$0xff]  }
 0x259   : > { %v930_v29 = vpop.f32.mrb[4].mxu1 }
 0x25a   : > { %v993_v30 = vpack.c.bf16 %v930_v29, %v930_v29  ;;  %v2774_v31 = vpop.f32.mrb[5].mxu1  ;;  %v3040_v29 = vld [vmem:[%s3379_s27 + $0x28] sm:$0xff]  }
 0x25b   : > { %v933_v32 = vpop.f32.mrb[6].mxu1  ;;  %v3042_v31 = vld [vmem:[%s3389_s26 + $0x28] sm:$0xff]  }
 0x25c   : > { %v999_v33 = vsel %vm994_vm3, %v993_v30, 0  ;;  %v2775_v34 = vpop.f32.mrb[7].mxu1  ;;  %v3041_v30 = vld [vmem:[%s3389_s26 + $0x20] sm:$0xff]  }
 0x25d   : > { %2785 = vmatpush3.bf16.xpose.msra.mxu1 %v999_v33 }
 0x25e   : > { %2796 = vmatprep.subr.bf16.mxu1 %v3185_v9 }
 0x261   : > { %v986_v35 = vpop.f32.mrb[8].mxu1 }
 0x262   : > { %v1053_v38 = vpack.c.bf16 %v986_v35, %v986_v35  ;;  %v2782_v39 = vpop.f32.mrb[9].mxu1 }
 0x263   : > { %v989_v40 = vpop.f32.mrb[10].mxu1 }
 0x264   : > { %v2783_v41 = vpop.f32.mrb[11].mxu1  ;;  %2787 = vmatmul.mubr.msk.bf16.vlgmr.msra.gmra.mrb[12].mxu1 %vm994_vm3, %v992_v37  ;;  %v1059_v42 = vsel %vm1057_vm4, %v1053_v38, 0 }
 0x265   : > { %2791 = vmatpush3.bf16.msra.mxu0 %v1059_v42  ;;  %2797 = vmatpush3.bf16.msra.mxu1 %v3033_v36 }
 0x266   : > { %2798 = vmatprep.subr.bf16.mxu1 %v3185_v9  ;;  %2800 = vmatprep.mubr.msk.bf16.mxu1 %vm3186_vm2, %v3185_v9 }
 0x267   : > { %2804 = vmatprep.subr.bf16.mxu0 %v3185_v9 }
 0x269   : > { %2799 = vmatpush3.bf16.msra.mxu1 %v3034_v43 }
 0x26a   : > { %2812 = vmatprep.subr.bf16.mxu1 %v3185_v9 }
 0x26c   : > { %2801 = vmatmul.mubr.msk.bf16.vlgmr.msra.gmra.mrb[16].mxu1 %vm791_vm1, %v3456_v21 }
 0x26d   : > { %2813 = vmatpush3.bf16.msra.mxu1 %v3035_v44  ;;  %2816 = vmatprep.mubr.msk.bf16.mxu1 %vm3186_vm2, %v3185_v9 }
 0x26e   : > { %2814 = vmatprep.subr.bf16.mxu1 %v3185_v9 }
 0x271   : > { %2815 = vmatpush3.bf16.msra.mxu1 %v3036_v45 }
 0x272   : > { %2826 = vmatprep.subr.bf16.mxu1 %v3185_v9 }
 0x274   : > { %2817 = vmatmul.mubr.msk.bf16.vlgmr.msra.gmra.mrb[20].mxu1 %vm791_vm1, %v3456_v21 }
 0x275   : > { %2828 = vmatprep.mubr.msk.bf16.mxu1 %vm3186_vm2, %v3185_v9 }
 0x337   : > { %v1035_v51 = vpop.f32.mrb[12].mxu1 }
 0x338   : > { %v1036_v52 = vadd.f32 %v1035_v51, %v3500_v50  ;;  %v2788_v53 = vpop.f32.mrb[13].mxu1 }
 0x339   : > { %v1038_v54 = vpop.f32.mrb[14].mxu1 }
 0x33a   : > { %v2789_v55 = vpop.f32.mrb[15].mxu1  ;;  %v1041_v56 = vsel %vm994_vm3, %v1036_v52, -inf }
 0x33b   : > { %1042 = vmax.xlane.f32.xlu1 %v1041_v56 }
 0x33f   : > { %v1152_v57 = vpop.f32.mrb[16].mxu1 }
 0x340   : > { %v2802_v58 = vpop.f32.mrb[17].mxu1  ;;  %v1272_v28 = vpack.c.bf16 %v1152_v57, %v1152_v57  ;;  %v3043_v57 = vld [vmem:[%s3384_s20 + $0x20] sm:$0xff]  }
 0x341   : > { %v1155_v59 = vpop.f32.mrb[18].mxu1 }
 0x342   : > { %v2803_v60 = vpop.f32.mrb[19].mxu1  ;;  %v3044_v59 = vld [vmem:[%s3384_s20 + $0x28] sm:$0xff]  }
 0x347   : > { %v1266_v61 = vpop.f32.mrb[20].mxu1 }
 0x348   : > { %v1332_v62 = vpack.c.bf16 %v1266_v61, %v1266_v61  ;;  %v2818_v63 = vpop.f32.mrb[21].mxu1 }
 0x349   : > { %v1269_v0 = vpop.f32.mrb[22].mxu1 }
 0x34a   : > { %v1337_v2 = vsel %vm1057_vm4, %v1332_v62, 0  ;;  %v2819_v3 = vpop.f32.mrb[23].mxu1 }
 0x34b   : > { %2827 = vmatpush3.bf16.msra.mxu1 %v1337_v2 }
 0x34c   : > { %2840 = vmatprep.subr.bf16.mxu1 %v3185_v9 }
 0x3c8   : > { %v1043_v4 = vpop.xlane.xlu1 %1042 }
 0x3c9   : > { %v1044_v5 = vsub.f32 %v1036_v52, %v1043_v4 }
 0x3cb   : > { %v1045_v6 = vmul.f32 1.442695, %v1044_v5 }
 0x3cd   : > { %3065 = vpow2.f32 %v1045_v6 }
 0x3d7   : > { %v3066_v7 = vpop.eup %3065 }
 0x3d8   : > { %v1047_v8 = vsel %vm994_vm3, %v3066_v7, 0.0 }
 0x3d9   : > { %1048 = vadd.xlane.f32.xlu1 %v1047_v8 }
 0x466   : > { %v1049_v10 = vpop.xlane.xlu1 %1048 }
 0x467   : > { %3067 = vrcp.f32 %v1049_v10  ;;  %v3046_v10 = vld [vmem:[%s3379_s27 + $0x38] sm:$0xff]  }
 0x471   : > { %v3068_v11 = vpop.eup %3067 }
 0x472   : > { %v1051_v12 = vmul.f32 %v3068_v11, %v3066_v7  ;;  %v3045_v7 = vld [vmem:[%s3379_s27 + $0x30] sm:$0xff]   ;;  %s3188_s27 = smov 8  }
 0x473   : > { %v3047_v11 = vld [vmem:[%s3389_s26 + $0x30] sm:$0xff]  }
 0x474   : > { %v1052_v14 = vpack.c.bf16 %v1051_v12, %v1051_v12  ;;  %v3048_v12 = vld [vmem:[%s3389_s26 + $0x38] sm:$0xff]   ;;  %s3189_s26 = smov 16  }
 0x476   : > { %2793 = vmatmul.mubr.msk.bf16.vlgmr.msra.gmra.mrb[0].mxu0 %vm994_vm3, %v1052_v14 }
 0x477   : > { %2805 = vmatpush3.bf16.msra.mxu0 %v3037_v13  ;;  %2808 = vmatprep.mubr.msk.bf16.mxu0 %vm3186_vm2, %v3185_v9 }
 0x478   : > { %2806 = vmatprep.subr.bf16.mxu0 %v3185_v9 }
 0x47b   : > { %2807 = vmatpush3.bf16.msra.mxu0 %v3038_v15 }
 0x47c   : > { %2820 = vmatprep.subr.bf16.mxu0 %v3185_v9 }
 0x47e   : > { %2809 = vmatmul.mubr.msk.bf16.vlgmr.msra.gmra.mrb[4].mxu0 %vm791_vm1, %v3456_v21 }
 0x47f   : > { %2822 = vmatprep.mubr.msk.bf16.mxu0 %vm3186_vm2, %v3185_v9 }
 0x549   : > { %v3518_v16 = vpop.f32.mrb[0].mxu0 }
 0x54a   : > { %v2794_v17 = vpop.f32.mrb[1].mxu0 }
 0x54b   : > { %v1098_v18 = vpop.f32.mrb[2].mxu0 }
 0x54c   : > { %v2795_v19 = vpop.f32.mrb[3].mxu0 }
 0x551   : > { %v1209_v20 = vpop.f32.mrb[4].mxu0 }
 0x552   : > { %v1273_v22 = vpack.c.bf16 %v1209_v20, %v1209_v20  ;;  %v2810_v23 = vpop.f32.mrb[5].mxu0 }
 0x553   : > { %v1212_v24 = vpop.f32.mrb[6].mxu0 }
 0x554   : > { %v1278_v25 = vsel %vm994_vm3, %v1273_v22, 0  ;;  %v2811_v26 = vpop.f32.mrb[7].mxu0 }
 0x555   : > { %2821 = vmatpush3.bf16.xpose.msra.mxu0 %v1278_v25 }
 0x556   : > { %2832 = vmatprep.subr.bf16.mxu0 %v3185_v9 }
 0x55c   : > { %2823 = vmatmul.mubr.msk.bf16.vlgmr.msra.gmra.mrb[8].mxu0 %vm994_vm3, %v1272_v28 }
 0x55d   : > { %2833 = vmatpush3.bf16.msra.mxu0 %v3039_v27  ;;  %2836 = vmatprep.mubr.msk.bf16.mxu0 %vm3186_vm2, %v3185_v9 }
 0x55e   : > { %2834 = vmatprep.subr.bf16.mxu0 %v3185_v9 }
 0x561   : > { %2835 = vmatpush3.bf16.msra.mxu0 %v3040_v29 }
 0x562   : > { %2848 = vmatprep.subr.bf16.mxu0 %v3185_v9 }
 0x564   : > { %2837 = vmatmul.mubr.msk.bf16.vlgmr.msra.gmra.mrb[12].mxu0 %vm791_vm1, %v3456_v21 }
 0x565   : > { %2849 = vmatpush3.bf16.msra.mxu0 %v3041_v30  ;;  %2852 = vmatprep.mubr.msk.bf16.mxu0 %vm3186_vm2, %v3185_v9 }
 0x566   : > { %2850 = vmatprep.subr.bf16.mxu0 %v3185_v9 }
 0x569   : > { %2851 = vmatpush3.bf16.msra.mxu0 %v3042_v31 }
 0x56a   : > { %2862 = vmatprep.subr.bf16.mxu0 %v3185_v9 }
 0x56c   : > { %2853 = vmatmul.mubr.msk.bf16.vlgmr.msra.gmra.mrb[16].mxu0 %vm791_vm1, %v3456_v21 }
 0x56d   : > { %2864 = vmatprep.mubr.msk.bf16.mxu0 %vm3186_vm2, %v3185_v9 }
 0x62f   : > { %v1314_v32 = vpop.f32.mrb[8].mxu0 }
 0x630   : > { %v1315_v33 = vadd.f32 %v1314_v32, %v3500_v50  ;;  %v2824_v34 = vpop.f32.mrb[9].mxu0 }
 0x631   : > { %v1317_v35 = vpop.f32.mrb[10].mxu0 }
 0x632   : > { %v2825_v36 = vpop.f32.mrb[11].mxu0  ;;  %v1320_v37 = vsel %vm994_vm3, %v1315_v33, -inf }
 0x633   : > { %1321 = vmax.xlane.f32.xlu0 %v1320_v37 }
 0x637   : > { %v1430_v38 = vpop.f32.mrb[12].mxu0 }
 0x638   : > { %v2838_v39 = vpop.f32.mrb[13].mxu0  ;;  %v1550_v8 = vpack.c.bf16 %v1430_v38, %v1430_v38 }
 0x639   : > { %v1433_v40 = vpop.f32.mrb[14].mxu0  ;;  %v3049_v39 = vld [vmem:[%s3384_s20 + $0x30] sm:$0xff]  }
 0x63a   : > { %v2839_v41 = vpop.f32.mrb[15].mxu0 }
 0x63b   : > { %v3050_v41 = vld [vmem:[%s3384_s20 + $0x38] sm:$0xff]   ;;  %s3816_s20 = sld [smem:[#allocation19_spill]] }
 0x63f   : > { %v1544_v42 = vpop.f32.mrb[16].mxu0 }
 0x640   : > { %v1610_v43 = vpack.c.bf16 %v1544_v42, %v1544_v42  ;;  %v2854_v44 = vpop.f32.mrb[17].mxu0 }
 0x641   : > { %v1547_v45 = vpop.f32.mrb[18].mxu0 }
 0x642   : > { %v1615_v46 = vsel %vm1057_vm4, %v1610_v43, 0  ;;  %v2855_v47 = vpop.f32.mrb[19].mxu0 }
 0x643   : > { %2863 = vmatpush3.bf16.msra.mxu0 %v1615_v46 }
 0x644   : > { %2876 = vmatprep.subr.bf16.mxu0 %v3185_v9 }
 0x6c0   : > { %v1322_v48 = vpop.xlane.xlu0 %1321 }
 0x6c1   : > { %v1323_v49 = vsub.f32 %v1315_v33, %v1322_v48 }
 0x6c3   : > { %v1324_v51 = vmul.f32 1.442695, %v1323_v49 }
 0x6c5   : > { %3069 = vpow2.f32 %v1324_v51 }
 0x6cf   : > { %v3070_v52 = vpop.eup %3069 }
 0x6d0   : > { %v1326_v53 = vsel %vm994_vm3, %v3070_v52, 0.0 }
 0x6d1   : > { %1327 = vadd.xlane.f32.xlu1 %v1326_v53 }
 0x75e   : > { %v1328_v54 = vpop.xlane.xlu1 %1327 }
 0x75f   : > { %3071 = vrcp.f32 %v1328_v54 }
 0x769   : > { %v3072_v55 = vpop.eup %3071 }
 0x76a   : > { %v1330_v56 = vmul.f32 %v3072_v55, %v3070_v52 }
 0x76c   : > { %v1331_v58 = vpack.c.bf16 %v1330_v56, %v1330_v56 }
 0x76e   : > { %2829 = vmatmul.mubr.msk.bf16.vlgmr.msra.gmra.mrb[24].mxu1 %vm994_vm3, %v1331_v58 }
 0x76f   : > { %2841 = vmatpush3.bf16.msra.mxu1 %v3043_v57  ;;  %2844 = vmatprep.mubr.msk.bf16.mxu1 %vm3186_vm2, %v3185_v9 }
 0x770   : > { %2842 = vmatprep.subr.bf16.mxu1 %v3185_v9 }
 0x773   : > { %2843 = vmatpush3.bf16.msra.mxu1 %v3044_v59 }
 0x774   : > { %2856 = vmatprep.subr.bf16.mxu1 %v3185_v9 }
 0x776   : > { %2845 = vmatmul.mubr.msk.bf16.vlgmr.msra.gmra.mrb[28].mxu1 %vm791_vm1, %v3456_v21 }
 0x777   : > { %2858 = vmatprep.mubr.msk.bf16.mxu1 %vm3186_vm2, %v3185_v9 }
 0x841   : > { %v3557_v60 = vpop.f32.mrb[24].mxu1 }
 0x842   : > { %v2830_v61 = vpop.f32.mrb[25].mxu1 }
 0x843   : > { %v1376_v62 = vpop.f32.mrb[26].mxu1 }
 0x844   : > { %v2831_v63 = vpop.f32.mrb[27].mxu1 }
 0x849   : > { %v1487_v0 = vpop.f32.mrb[28].mxu1 }
 0x84a   : > { %v1551_v2 = vpack.c.bf16 %v1487_v0, %v1487_v0  ;;  %v2846_v3 = vpop.f32.mrb[29].mxu1 }
 0x84b   : > { %v1490_v4 = vpop.f32.mrb[30].mxu1 }
 0x84c   : > { %v1556_v5 = vsel %vm994_vm3, %v1551_v2, 0  ;;  %v2847_v6 = vpop.f32.mrb[31].mxu1 }
 0x84d   : > { %2857 = vmatpush3.bf16.xpose.msra.mxu1 %v1556_v5  ;;  %v3052_v5 = vld [vmem:[%s3816_s20 + $0x8] sm:$0xff]  }
 0x84e   : > { %2868 = vmatprep.subr.bf16.mxu1 %v3185_v9 }
 0x854   : > { %2859 = vmatmul.mubr.msk.bf16.vlgmr.msra.gmra.mrb[32].mxu1 %vm994_vm3, %v1550_v8 }
 0x855   : > { %2869 = vmatpush3.bf16.msra.mxu1 %v3045_v7  ;;  %2872 = vmatprep.mubr.msk.bf16.mxu1 %vm3186_vm2, %v3185_v9 }
 0x856   : > { %2870 = vmatprep.subr.bf16.mxu1 %v3185_v9 }
 0x859   : > { %2871 = vmatpush3.bf16.msra.mxu1 %v3046_v10 }
 0x85a   : > { %2884 = vmatprep.subr.bf16.mxu1 %v3185_v9 }
 0x85c   : > { %2873 = vmatmul.mubr.msk.bf16.vlgmr.msra.gmra.mrb[36].mxu1 %vm791_vm1, %v3456_v21 }
 0x85d   : > { %2885 = vmatpush3.bf16.msra.mxu1 %v3047_v11  ;;  %2888 = vmatprep.mubr.msk.bf16.mxu1 %vm3186_vm2, %v3185_v9 }
 0x85e   : > { %2886 = vmatprep.subr.bf16.mxu1 %v3185_v9 }
 0x861   : > { %2887 = vmatpush3.bf16.msra.mxu1 %v3048_v12 }
 0x862   : > { %2898 = vmatprep.subr.bf16.mxu1 %v3185_v9 }
 0x864   : > { %2889 = vmatmul.mubr.msk.bf16.vlgmr.msra.gmra.mrb[40].mxu1 %vm791_vm1, %v3456_v21 }
 0x865   : > { %2900 = vmatprep.mubr.msk.bf16.mxu1 %vm3186_vm2, %v3185_v9 }
 0x927   : > { %v1592_v13 = vpop.f32.mrb[32].mxu1 }
 0x928   : > { %v1593_v14 = vadd.f32 %v1592_v13, %v3500_v50  ;;  %v2860_v15 = vpop.f32.mrb[33].mxu1 }
 0x929   : > { %v1595_v17 = vpop.f32.mrb[34].mxu1 }
 0x92a   : > { %v2861_v18 = vpop.f32.mrb[35].mxu1  ;;  %v1598_v19 = vsel %vm994_vm3, %v1593_v14, -inf }
 0x92b   : > { %1599 = vmax.xlane.f32.xlu0 %v1598_v19  ;;  %v2655_v19 = vld [vmem:[%s3817_s17] ss:$0 sm:$0xff]  ;;  %s3823_s17 = sld [smem:[#allocation28_spill]] (!%p2674_p1) }
 0x92f   : > { %v1708_v20 = vpop.f32.mrb[36].mxu1 }
 0x930   : > { %v2874_v22 = vpop.f32.mrb[37].mxu1  ;;  %v1828_v53 = vpack.c.bf16 %v1708_v20, %v1708_v20 }
 0x931   : > { %v1711_v23 = vpop.f32.mrb[38].mxu1 }
 0x932   : > { %v2875_v24 = vpop.f32.mrb[39].mxu1 }
 0x937   : > { %v1822_v25 = vpop.f32.mrb[40].mxu1 }
 0x938   : > { %v1888_v26 = vpack.c.bf16 %v1822_v25, %v1822_v25  ;;  %v2890_v27 = vpop.f32.mrb[41].mxu1 }
 0x939   : > { %v1825_v28 = vpop.f32.mrb[42].mxu1 }
 0x93a   : > { %v1893_v29 = vsel %vm1057_vm4, %v1888_v26, 0  ;;  %v2891_v30 = vpop.f32.mrb[43].mxu1 }
 0x93b   : > { %2899 = vmatpush3.bf16.msra.mxu1 %v1893_v29 }
 0x93c   : > { %2912 = vmatprep.subr.bf16.mxu1 %v3185_v9 }
 0x9b8   : > { %v1600_v31 = vpop.xlane.xlu0 %1599 }
 0x9b9   : > { %v1601_v32 = vsub.f32 %v1593_v14, %v1600_v31 }
 0x9bb   : > { %v1602_v33 = vmul.f32 1.442695, %v1601_v32  ;;  %v3053_v32 = vld [vmem:[%s3412_s5] sm:$0xff]  }
 0x9bd   : > { %3073 = vpow2.f32 %v1602_v33  ;;  %v3055_v33 = vld [vmem:[%s3421_s14] sm:$0xff]  }
 0x9c7   : > { %v3074_v34 = vpop.eup %3073 }
 0x9c8   : > { %v1604_v35 = vsel %vm994_vm3, %v3074_v34, 0.0 }
 0x9c9   : > { %1605 = vadd.xlane.f32.xlu1 %v1604_v35 }
 0xa56   : > { %v1606_v36 = vpop.xlane.xlu1 %1605 }
 0xa57   : > { %3075 = vrcp.f32 %v1606_v36 }
 0xa61   : > { %v3076_v37 = vpop.eup %3075 }
 0xa62   : > { %v1608_v38 = vmul.f32 %v3076_v37, %v3074_v34 }
 0xa64   : > { %v1609_v40 = vpack.c.bf16 %v1608_v38, %v1608_v38  ;;  %v2659_v38 = vld [vmem:[%s3818_s4] ss:$0 sm:$0xff] }
 0xa66   : > { %2865 = vmatmul.mubr.msk.bf16.vlgmr.msra.gmra.mrb[20].mxu0 %vm994_vm3, %v1609_v40  ;;  %v2660_v40 = vld [vmem:[%s757_s0] ss:$0 sm:$0xff] }
 0xa67   : > { %2877 = vmatpush3.bf16.msra.mxu0 %v3049_v39  ;;  %2880 = vmatprep.mubr.msk.bf16.mxu0 %vm3186_vm2, %v3185_v9 }
 0xa68   : > { %2878 = vmatprep.subr.bf16.mxu0 %v3185_v9 }
 0xa6b   : > { %2879 = vmatpush3.bf16.msra.mxu0 %v3050_v41 }
 0xa6c   : > { %2892 = vmatprep.subr.bf16.mxu0 %v3185_v9 }
 0xa6e   : > { %2881 = vmatmul.mubr.msk.bf16.vlgmr.msra.gmra.mrb[24].mxu0 %vm791_vm1, %v3456_v21 }
 0xa6f   : > { %2894 = vmatprep.mubr.msk.bf16.mxu0 %vm3186_vm2, %v3185_v9 }
 0xb39   : > { %v1651_v42 = vpop.f32.mrb[20].mxu0 }
 0xb3a   : > { %v2866_v43 = vpop.f32.mrb[21].mxu0 }
 0xb3b   : > { %v1654_v44 = vpop.f32.mrb[22].mxu0 }
 0xb3c   : > { %v2867_v45 = vpop.f32.mrb[23].mxu0  ;;  %v3056_v44 = vld [vmem:[%s3421_s14 + $0x8] sm:$0xff]  }
 0xb3d   : > { %v3057_v45 = vld [vmem:[%s3421_s14 + $0x10] sm:$0xff]  }
 0xb41   : > { %v1765_v46 = vpop.f32.mrb[24].mxu0 }
 0xb42   : > { %v1829_v47 = vpack.c.bf16 %v1765_v46, %v1765_v46  ;;  %v2882_v48 = vpop.f32.mrb[25].mxu0  ;;  %v3058_v46 = vld [vmem:[%s3421_s14 + $0x18] sm:$0xff]  }
 0xb43   : > { %v1768_v49 = vpop.f32.mrb[26].mxu0  ;;  %v3060_v48 = vld [vmem:[%s3421_s14 + $0x28] sm:$0xff]  }
 0xb44   : > { %v1834_v51 = vsel %vm994_vm3, %v1829_v47, 0  ;;  %v2883_v52 = vpop.f32.mrb[27].mxu0  ;;  %v3059_v47 = vld [vmem:[%s3421_s14 + $0x20] sm:$0xff]   ;;  %v3061_v49 = vld [vmem:[%s3421_s14 + $0x30] sm:$0xff]  }
 0xb45   : > { %2893 = vmatpush3.bf16.xpose.msra.mxu0 %v1834_v51  ;;  %v3062_v51 = vld [vmem:[%s3421_s14 + $0x38] sm:$0xff]   ;;  %v2661_v52 = vld [vmem:[%s765_s6] ss:$0 sm:$0xff] }
 0xb46   : > { %2904 = vmatprep.subr.bf16.mxu0 %v3185_v9 }
 0xb4c   : > { %2895 = vmatmul.mubr.msk.bf16.vlgmr.msra.gmra.mrb[28].mxu0 %vm994_vm3, %v1828_v53 }
 0xb4d   : > { %2908 = vmatprep.mubr.msk.bf16.mxu0 %vm3186_vm2, %v3185_v9 }
 0xc1f   : > { %v1870_v21 = vpop.f32.mrb[28].mxu0 }
 0xc20   : > { %v1871_v54 = vadd.f32 %v1870_v21, %v3500_v50  ;;  %v2896_v55 = vpop.f32.mrb[29].mxu0 }
 0xc21   : > { %v1873_v56 = vpop.f32.mrb[30].mxu0 }
 0xc22   : > { %v2897_v57 = vpop.f32.mrb[31].mxu0  ;;  %v1876_v58 = vsel %vm994_vm3, %v1871_v54, -inf }
 0xc23   : > { %1877 = vmax.xlane.f32.xlu0 %v1876_v58 }
 0xc39   : > { %1936 = vrot.lane.b32.xlu0 %v3557_v60, %s3188_s27  ;;  %v3051_v60 = vld [vmem:[%s3816_s20] sm:$0xff]  }
 0xc3a   : > { %2905 = vmatpush3.bf16.msra.mxu0 %v3051_v60 }
 0xc3b   : > { %2906 = vmatprep.subr.bf16.mxu0 %v3185_v9 }
 0xc3e   : > { %2907 = vmatpush3.bf16.msra.mxu0 %v3052_v5 }
 0xc3f   : > { %2920 = vmatprep.subr.bf16.mxu0 %v3185_v9 }
 0xcb0   : > { %v1878_v59 = vpop.xlane.xlu0 %1877 }
 0xcb1   : > { %v1879_v61 = vsub.f32 %v1871_v54, %v1878_v59 }
 0xcb3   : > { %v1880_v62 = vmul.f32 1.442695, %v1879_v61 }
 0xcb4   : > { %v1937_v11 = vpop.permute.xlu0 %1936 }
 0xcb5   : > { %3077 = vpow2.f32 %v1880_v62  ;;  %v1947_v13 = vsel %vm994_vm3, %v3518_v16, %v1937_v11 }
 0xcbf   : > { %v3078_v63 = vpop.eup %3077 }
 0xcc0   : > { %v1882_v0 = vsel %vm994_vm3, %v3078_v63, 0.0 }
 0xcc1   : > { %1883 = vadd.xlane.f32.xlu1 %v1882_v0 }
 0xcd2   : > { %1940 = vrot.lane.b32.xlu1 %v1651_v42, %s3189_s26 }
 0xd4e   : > { %v1884_v50 = vpop.xlane.xlu1 %1883 }
 0xd4f   : > { %3079 = vrcp.f32 %v1884_v50 }
 0xd52   : > { %v1941_v12 = vpop.permute.xlu1 %1940 }
 0xd53   : > { %v1949_v14 = vsel %vm1948_vm6, %v1947_v13, %v1941_v12 }
 0xd59   : > { %v3080_v2 = vpop.eup %3079 }
 0xd5a   : > { %v1886_v3 = vmul.f32 %v3080_v2, %v3078_v63 }
 0xd5c   : > { %v1887_v4 = vpack.c.bf16 %v1886_v3, %v1886_v3 }
 0xd5e   : > { %2901 = vmatmul.mubr.msk.bf16.vlgmr.msra.gmra.mrb[44].mxu1 %vm994_vm3, %v1887_v4  ;;  %v2673_v4 = vld [vmem:[%s773_s16] ss:$0 sm:$0xff] }
 0xd5f   : > { %2916 = vmatprep.mubr.msk.bf16.mxu1 %vm3186_vm2, %v3185_v9  ;;  %2913 = vmatpush3.bf16.msra.mxu1 %v3053_v32 }
 0xd60   : > { %2914 = vmatprep.subr.bf16.mxu1 %v3185_v9 }
 0xe31   : > { %v1929_v6 = vpop.f32.mrb[44].mxu1 }
 0xe32   : > { %1944 = vrot.lane.b32.xlu1 %v1929_v6, %s3190_s19  ;;  %v2902_v7 = vpop.f32.mrb[45].mxu1  ;;  %s3822_s19 = sld [smem:[#allocation27_spill]] (!%p2674_p1) }
 0xe33   : > { %v1932_v8 = vpop.f32.mrb[46].mxu1 }
 0xe34   : > { %v2903_v10 = vpop.f32.mrb[47].mxu1 }
 0xea4   : > { %v1945_v15 = vpop.permute.xlu1 %1944 }
 0xea5   : > { %v1951_v17 = vsel %vm1950_vm7, %v1949_v14, %v1945_v15 }
 0xea6   : > { %v1952_v18 = vpack.c.bf16 %v1951_v17, %v1951_v17  ;;  %v3085_v17 = vld [vmem:[%s3821_s13] sm:$0xff] (!%p2674_p1)  }
 0xea8   : > { %2909 = vmatmul.mubr.msk.bf16.vlgmr.msra.gmra.mrb[32].mxu0 %vm791_vm1, %v1952_v18  ;;  %v3191_v18 = vmov (!%p2674_p1), 0.0  }
 0xea9   : > { %2936 = vmatprep.mubr.msk.bf16.mxu0 %vm3186_vm2, %v3185_v9  ;;  %2921 = vmatpush3.bf16.msra.mxu0 %v3055_v33 }
 0xeaa   : > { %2922 = vmatprep.subr.bf16.mxu0 %v3185_v9 }
 0xead   : > { %2923 = vmatpush3.bf16.msra.mxu0 %v3056_v44 }
 0xeae   : > { %2924 = vmatprep.subr.bf16.mxu0 %v3185_v9 }
 0xeb1   : > { %2925 = vmatpush3.bf16.msra.mxu0 %v3057_v45 }
 0xeb2   : > { %2926 = vmatprep.subr.bf16.mxu0 %v3185_v9 }
 0xeb5   : > { %2927 = vmatpush3.bf16.msra.mxu0 %v3058_v46 }
 0xeb6   : > { %2928 = vmatprep.subr.bf16.mxu0 %v3185_v9 }
 0xeb9   : > { %2929 = vmatpush3.bf16.msra.mxu0 %v3059_v47 }
 0xeba   : > { %2930 = vmatprep.subr.bf16.mxu0 %v3185_v9 }
 0xebd   : > { %2931 = vmatpush3.bf16.msra.mxu0 %v3060_v48 }
 0xebe   : > { %2932 = vmatprep.subr.bf16.mxu0 %v3185_v9 }
 0xec1   : > { %2933 = vmatpush3.bf16.msra.mxu0 %v3061_v49 }
 0xec2   : > { %2934 = vmatprep.subr.bf16.mxu0 %v3185_v9 }
 0xec5   : > { %2935 = vmatpush3.bf16.msra.mxu0 %v3062_v51 }
 0xec6   : > { %2940 = vmatprep.subr.bf16.mxu0 (!%p2674_p1), %v3191_v18 }
 0xf7b   : > { %v2013_v20 = vpop.f32.mrb[32].mxu0 }
 0xf7c   : > { %v2014_v22 = vadd.f32 %v2655_v19, %v2013_v20  ;;  %v2910_v23 = vpop.f32.mrb[33].mxu0  ;;  %v3086_v19 = vld [vmem:[%s3821_s13 + $0x8] sm:$0xff] (!%p2674_p1)  }
 0xf7d   : > { %v2016_v16 = vpop.f32.mrb[34].mxu0 }
 0xf7e   : > { %v3623_v24 = vadd.f32 %v2014_v22, %v3429_v1  ;;  %v2911_v25 = vpop.f32.mrb[35].mxu0  ;;  %v3054_v1 = vld [vmem:[%s3412_s5 + $0x8] sm:$0xff]  }
 0xf7f   : > { %2915 = vmatpush3.bf16.msra.mxu1 %v3054_v1 }
 0xf80   : > { %v2022_v26 = vsel %vm791_vm1, %v3623_v24, 0.0 }
 0xf81   : > { %2023 = vadd.xlane.f32.xlu1 %v2022_v26  ;;  %v2676_v26 = vld [vmem:[%s3823_s17] ss:$0 sm:$0xff] (!%p2674_p1) }
0x100e   : > { %v2024_v27 = vpop.xlane.xlu1 %2023 }
0x100f   : > { %v2025_v28 = vmul.f32 0.03125, %v2024_v27 }
0x1011   : > { %v2026_v29 = vsub.f32 %v3623_v24, %v2025_v28 }
0x1013   : > { %v2027_v30 = vmul.f32 %v2026_v29, %v2026_v29 }
0x1015   : > { %v2028_v31 = vsel %vm791_vm1, %v2027_v30, 0.0 }
0x1016   : > { %2029 = vadd.xlane.f32.xlu0 %v2028_v31 }
0x10a3   : > { %v2030_v34 = vpop.xlane.xlu0 %2029 }
0x10a4   : > { %v2031_v35 = vmul.f32 0.03125, %v2030_v34 }
0x10a6   : > { %v2032_v36 = vadd.f32 1e-05, %v2031_v35 }
0x10a8   : > { %3081 = vrsqrt.f32 %v2032_v36 }
0x10b2   : > { %v3082_v37 = vpop.eup %3081 }
0x10b3   : > { %v2034_v39 = vmul.f32 %v3082_v37, %v2026_v29 }
0x10b5   : > { %v2041_v41 = vmul.f32 %v2659_v38, %v2034_v39 }
0x10b7   : > { %v2048_v42 = vadd.f32 %v2660_v40, %v2041_v41 }
0x10b9   : > { %v2049_v43 = vpack.c.bf16 %v2048_v42, %v2048_v42 }
0x10bb   : > { %2917 = vmatmul.mubr.msk.bf16.vlgmr.msra.gmra.mrb[48].mxu1 %vm791_vm1, %v2049_v43 }
0x118e   : > { %v2110_v53 = vpop.f32.mrb[48].mxu1 }
0x118f   : > { %v2111_v21 = vadd.f32 %v2661_v52, %v2110_v53  ;;  %v2918_v54 = vpop.f32.mrb[49].mxu1 }
0x1190   : > { %v2113_v55 = vpop.f32.mrb[50].mxu1 }
0x1191   : > { %v2117_v56 = vmul.f32 %v2111_v21, %v2111_v21  ;;  %v2919_v57 = vpop.f32.mrb[51].mxu1  ;;  %v2116_v9 = vmul.f32 0.5, %v2111_v21 }
0x1193   : > { %v2118_v58 = vmul.f32 %v2117_v56, %v2111_v21 }
0x1195   : > { %v2119_v59 = vmul.f32 0.044715, %v2118_v58 }
0x1197   : > { %v2120_v61 = vadd.f32 %v2119_v59, %v2111_v21 }
0x1199   : > { %v2121_v62 = vmul.f32 0.7978845, %v2120_v61 }
0x119b   : > { %3083 = vtanh.f32 %v2121_v62 }
0x11a5   : > { %v3084_v63 = vpop.eup %3083 }
0x11a6   : > { %v2123_v0 = vadd.f32 1.0, %v3084_v63 }
0x11a8   : > { %v2124_v50 = vmul.f32 %v2123_v0, %v2116_v9 }
0x11aa   : > { %v2125_v2 = vpack.c.bf16 %v2124_v50, %v2124_v50 }
0x11ac   : > { %2937 = vmatmul.mubr.bf16.vlgmr.msra.gmra.mrb[36].mxu0 %v2125_v2 }
0x11ad   : > { %2944 = vmatprep.mubr.msk.bf16.mxu0 (!%p2674_p1), %vm3192_vm8, %v3191_v18  ;;  %2941 = vmatpush3.bf16.msra.mxu0 (!%p2674_p1), %v3085_v17 }
0x11ae   : > { %2942 = vmatprep.subr.bf16.mxu0 (!%p2674_p1), %v3191_v18 }
0x11b1   : > { %2943 = vmatpush3.bf16.msra.mxu0 (!%p2674_p1), %v3086_v19 }
0x127e   : > { %2243 = sbr.rel (%p2674_p1) target bundleno = 5270 (0x1496), region = 96 }
0x127f   : > { %v2224_v3 = vpop.f32.mrb[36].mxu0 }
0x1280   : > { %v2230_v60 = vadd.f32 %v2224_v3, %v3623_v24  ;;  %v2938_v5 = vpop.f32.mrb[37].mxu0  ;;  %v2675_v24 = vld [vmem:[%s3822_s19] ss:$0 sm:$0xff] (!%p2674_p1) }
0x1281   : > { %v2227_v6 = vpop.f32.mrb[38].mxu0 }
0x1282   : > { %v2238_v7 = vadd.f32 %v2673_v4, %v2230_v60  ;;  %v2939_v8 = vpop.f32.mrb[39].mxu0 }
0x1284   : > { %2239 = vst.msk [vmem:[#allocation2] sm:$0xff] %vm791_vm1, %v2238_v7  ;;  %v2246_v10 = vsel (!%p2674_p1), %vm791_vm1, %v2238_v7, 0.0 }
0x1285   : > { %2247 = vadd.xlane.f32.xlu0 %v2246_v10 }
0x1312   : > { %v2248_v11 = vpop.xlane.xlu0 %2247 }
0x1313   : > { %v2249_v12 = vmul.f32 0.03125, %v2248_v11 }
0x1315   : > { %v2250_v13 = vsub.f32 %v2238_v7, %v2249_v12 }
0x1317   : > { %v2251_v14 = vmul.f32 %v2250_v13, %v2250_v13 }
0x1319   : > { %v2252_v15 = vsel %vm791_vm1, %v2251_v14, 0.0 }
0x131a   : > { %2253 = vadd.xlane.f32.xlu0 %v2252_v15 }
0x13a7   : > { %v2254_v20 = vpop.xlane.xlu0 %2253 }
0x13a8   : > { %v2255_v22 = vmul.f32 0.03125, %v2254_v20 }
0x13aa   : > { %v2256_v23 = vadd.f32 1e-05, %v2255_v22 }
0x13ac   : > { %3087 = vrsqrt.f32 %v2256_v23 }
0x13b6   : > { %v3088_v16 = vpop.eup %3087 }
0x13b7   : > { %v2258_v25 = vmul.f32 %v3088_v16, %v2250_v13 }
0x13b9   : > { %v2265_v27 = vmul.f32 %v2675_v24, %v2258_v25 }
0x13bb   : > { %v2272_v28 = vadd.f32 %v2676_v26, %v2265_v27 }
0x13bd   : > { %v2273_v29 = vpack.c.bf16 %v2272_v28, %v2272_v28 }
0x13bf   : > { %2945 = vmatmul.mubr.msk.bf16.vlgmr.msra.gmra.mrb[0].mxu0 %vm791_vm1, %v2273_v29 }
0x1492   : > { %v2327_v30 = vpop.f32.mrb[0].mxu0 }
0x1493   : > { %2333 = vst [vmem:[%s718_s3] sm:$0xff] %v2327_v30  ;;  %v2946_v31 = vpop.f32.mrb[1].mxu0 }
0x1494   : > { %v2330_v32 = vpop.f32.mrb[2].mxu0 }
0x1495   : > { %v2947_v1 = vpop.f32.mrb[3].mxu0 }
0x1496 PF: > { %s3824_s28 = sld [smem:[#allocation10_spill]]  ;;  %s3825_s22 = sld [smem:[#allocation7_spill]] }
0x1497   : > { %s3827_s1 = sld [smem:[#allocation30_spill]]  ;;  %s2348_s14 = sshll.u32 %s718_s3, 4  ;;  %s2349_s14 = int_to_ptr.vmem [resolvable:$true] %s2348_s14 }
0x1498   : > { %s3089_s24 = scalar_lea.vmem %s2349_s14, 128  ;;  %s3193_s16 = smov [#allocation3]  }
0x1499   : > { %p3090_p2 = scmp.ne.s32.totalorder %s2349_s14, %s3089_s24  ;;  %s3093_s23 = sshll.u32 %s3193_s16, 4  ;;  %s3094_s23 = int_to_ptr.vmem [resolvable:$false] %s3093_s23 }
0x149a   : > { %s3095_s27 = scalar_lea.vmem %s3094_s23, 256  ;;  %p3096_p6 = scmp.lt.s32.totalorder %s2349_s14, %s3094_s23 }
0x149b   : > { %p3091_p4 = pnand %p3090_p2, %p3333_p3  ;;  %p3097_p7 = scmp.lt.s32.totalorder %s3095_s27, %s3089_s24 }
0x149c   : > { %s2681_s5 = sshll.u32 %s3824_s28, 7  ;;  %s3828_s30 = sand.u32 1, %s3825_s22  }
0x149d   : > { %s3692_s6 = scalar_lea.hbm %s3827_s1, %s2681_s5  ;;  %s2335_s21 = scalar_lea.sflag [#allocation4], %s3828_s30 }
0x149e   : > { %p3092_p5 = pneg %p3091_p4  ;;  %p3098_p8 = por %p3097_p7, %p3096_p6 }
0x14a0   : > { %p3099_p10 = pnand %p3098_p8, %p3092_p5 }
0x14a2   : > { %3102 = shalt.err (!%p3099_p10)
}
0x14a3   : > { %s3103_s29 = scalar_lea.hbm %s3692_s6, 128  ;;  %s3107_s26 = scalar_lea.hbm %s3827_s1, 256 }
0x14a4   : > { %p3104_p11 = scmp.ne.s32.totalorder %s3692_s6, %s3103_s29  ;;  %p3108_p0 = scmp.lt.u32.totalorder %s3692_s6, %s3827_s1 }
0x14a5   : > { %p3109_p1 = scmp.lt.u32.totalorder %s3107_s26, %s3103_s29  ;;  %p3111_p4 = scmp.lt.u32.totalorder %s3103_s29, %s3692_s6 }
0x14a6   : > { %p3105_p12 = pnand %p3104_p11, %p3333_p3 }
0x14a7   : > { %p3110_p2 = por %p3109_p1, %p3108_p0 }
0x14a8   : > { %p3106_p13 = pneg %p3105_p12 }
0x14a9   : > { %p3112_p5 = por %p3111_p4, %p3110_p2 }
0x14ab   : > { %p3113_p6 = pnand %p3112_p5, %p3106_p13 }
0x14ad   : > { %3116 = shalt.err (!%p3113_p6)
}
0x14ae   : > { %2948 = dma.vmem_to_hbm [thread:$0]  (%p3333_p3), %s2349_s14, 128, %s3692_s6, %s2335_s21  }
0x14af PF: > { %s3829_s18 = sld [smem:[#allocation13_spill]]  ;;  %s3830_s17 = sld [smem:[#allocation6_spill]] }
0x14b5   : > { %p2954_p7 = scmp.ge.s32.totalorder %s3829_s18, 2  ;;  %s2360_s22 = sand.u32 1, %s3830_s17  }
0x14b6   : > { %s2361_s5 = scalar_lea.sflag [#allocation4], %s2360_s22 }
0x14b7   : > { %p2951_p8 = pnand %p2954_p7, %p3343_p9 }
0x14b9   : > { %3150 = dma.done.wait (!%p2951_p8), %s2361_s5, 128  }
0x14ba   : > { %3152 = vsyncadd (!%p2951_p8), %s2361_s5, 4294967168  ;;  %s30_s30 = sadd.s32 1, %s3829_s18   ;;  %s3832_s24 = sld [smem:[#allocation7_spill]] }
0x14bb   : > { %p27_p10 = scmp.ge.s32.totalorder %s30_s30, 6   ;;  %s3833_s25 = sld [smem:[#allocation8_spill]] }
0x14bc   : > { %s3834_s26 = sld [smem:[#allocation18_spill]]  ;;  %s3835_s27 = sld [smem:[#allocation11_spill]] }
0x14bd   : > { %s3836_s28 = sld [smem:[#allocation12_spill]]  ;;  %s3837_s29 = sld [smem:[#allocation14_spill]] }
0x14be   : > { %s3838_s0 = sld [smem:[#allocation16_spill]]  ;;  %29 = sbr.rel (!%p27_p10) target bundleno = 17 (0x11), region = 179 }
0x14c5   :  { %2366 = vsyncpa [#allocation4], 1 }
0x14c6   :  { %2368 = vsyncpa [#allocation4 + $0x1], 1 }

</bundles_post_ra>
